<compile_context>
chip_gen: v7x
topology: tpu7x:2x2x1
jax: 0.10.0
libtpu: 0.0.40
codegen_flags: <defaults>
</compile_context>

<pallas_src>
import jax
import jax.numpy as jnp
from jax.experimental import pallas as pl
from jax.experimental.pallas import tpu as pltpu


# ----------------------------- small helpers --------------------------------

def _round_up(x, m):
    return (x + m - 1) // m * m


def _batch_tile(n, target):
    """Batch tile (multiple of 8) and padded batch size (tile divides it)."""
    target = max(8, _round_up(target, 8))
    n8 = _round_up(max(n, 1), 8)
    if n8 <= target:
        return n8, n8
    steps = -(-n // target)                  # ceil(n / target)
    tile = _round_up(-(-n // steps), 8)      # <= target (target % 8 == 0)
    return tile, tile * steps


def _conv_toeplitz(w, w_in, parity):
    """Width-Toeplitz factor of a conv weight for one output-column parity.

    w : (cout, cin, kh, kw) PyTorch conv weight.
    Returns T of shape (kh, w_in*cin, (ow//2)*cout) with
      T[i, wc*cin + ci, oxh*cout + co] = w[co, ci, i, wc - (2*oxh + parity)]
    (zero where the kernel column index falls outside [0, kw)).  A row slab of
    the activation flattened to (rows, w_in*cin), right-multiplied by T[i],
    yields the kernel-row-i conv contribution for output columns of the given
    parity, already in the lane-dense (oxh, cout) layout.
    """
    cout, cin, kh, kw = w.shape
    ow_half = (w_in - kw + 1) // 2
    wt = jnp.transpose(w, (2, 3, 1, 0)).astype(jnp.float32)      # (kh, kw, cin, cout)
    wc = jnp.arange(w_in)
    ox = 2 * jnp.arange(ow_half) + parity
    j = wc[:, None] - ox[None, :]                                # (w_in, ow_half)
    valid = (j >= 0) & (j < kw)
    t = wt[:, jnp.clip(j, 0, kw - 1)]                            # (kh, w_in, ow_half, cin, cout)
    t = jnp.where(valid[None, :, :, None, None], t, 0.0)
    t = jnp.transpose(t, (0, 1, 3, 2, 4))                        # (kh, w_in, cin, ow_half, cout)
    return t.reshape(kh, w_in * cin, ow_half * cout)


# ------------- fused conv(5x5, valid) + bias + 2x2 max-pool + ReLU ----------

def _conv_pool_relu_body(x_ref, te_ref, to_ref, b_ref):
    """x_ref : (H, TB, W*Cin)   H-major activation tile (TB % 8 == 0)
    te/to : (KH, W*Cin, (OW//2)*Cout)  Toeplitz factors (even / odd out col)
    b_ref : (1, (OW//2)*Cout)          bias tiled over pooled output columns
    Returns (OH//2, TB, (OW//2)*Cout)."""
    kh = te_ref.shape[0]
    h_in, tb, k_in = x_ref.shape
    oh = h_in - kh + 1
    nl = te_ref.shape[-1]

    acc_e = jnp.zeros((oh * tb, nl), jnp.float32)
    acc_o = jnp.zeros((oh * tb, nl), jnp.float32)
    for i in range(kh):                                   # kh accumulated MXU dots
        xm = x_ref[i:i + oh, :, :].reshape(oh * tb, k_in)  # leading-dim merge
        acc_e = acc_e + jnp.dot(xm, te_ref[i, :, :], preferred_element_type=jnp.float32)
        acc_o = acc_o + jnp.dot(xm, to_ref[i, :, :], preferred_element_type=jnp.float32)

    y = jnp.maximum(acc_e, acc_o)                         # pool over column pairs
    y = y.reshape(oh // 2, 2, tb, nl)                     # leading-dim split
    y = jnp.maximum(y[:, 0], y[:, 1])                     # pool over row pairs
    return jnp.maximum(y + b_ref[...], 0.0)               # bias + ReLU


def _conv1_kernel(x_ref, te_ref, to_ref, b_ref, o_ref):
    o_ref[...] = _conv_pool_relu_body(x_ref, te_ref, to_ref, b_ref)


def conv1_pool_relu(x_hmaj, w, b, *, batch_tile):
    """x_hmaj: (H, N_pad, W) f32, Cin == 1, N_pad % batch_tile == 0.
    Returns (OH//2, N_pad, (OW//2)*Cout), lane index = oxh*Cout + co."""
    h_in, n_pad, w_in = x_hmaj.shape
    cout, cin, kh, kw = w.shape
    assert cin == 1 and n_pad % batch_tile == 0
    oh, ow = h_in - kh + 1, w_in - kw + 1
    ohp, owp = oh // 2, ow // 2
    nl = owp * cout

    te = _conv_toeplitz(w, w_in, 0)
    to = _conv_toeplitz(w, w_in, 1)
    bc = jnp.tile(b.astype(jnp.float32), owp).reshape(1, nl)

    grid = (n_pad // batch_tile,)
    flops = 2 * 2 * kh * (oh * n_pad) * (w_in * cin) * nl
    bytes_accessed = 4 * (h_in * n_pad * w_in + 2 * te.size + nl + ohp * n_pad * nl)

    return pl.pallas_call(
        _conv1_kernel,
        out_shape=jax.ShapeDtypeStruct((ohp, n_pad, nl), jnp.float32),
        grid=grid,
        in_specs=[
            pl.BlockSpec((h_in, batch_tile, w_in), lambda i: (0, i, 0)),
            pl.BlockSpec((kh, w_in * cin, nl), lambda i: (0, 0, 0)),
            pl.BlockSpec((kh, w_in * cin, nl), lambda i: (0, 0, 0)),
            pl.BlockSpec((1, nl), lambda i: (0, 0)),
        ],
        out_specs=pl.BlockSpec((ohp, batch_tile, nl), lambda i: (0, i, 0)),
        compiler_params=pltpu.CompilerParams(dimension_semantics=("parallel",)),
        cost_estimate=pl.CostEstimate(flops=flops, transcendentals=0,
                                      bytes_accessed=bytes_accessed),
    )(x_hmaj.astype(jnp.float32), te, to, bc)


# -------- fused conv2 + pool + ReLU + flatten + fc1 + ReLU + fc2 + lsm -------

def _conv2_head_kernel(a_ref, te_ref, to_ref, bc_ref,
                       w1_ref, b1_ref, w2_ref, b2_ref, o_ref):
    y = _conv_pool_relu_body(a_ref, te_ref, to_ref, bc_ref)   # (OH//2, TB, OWp*Cout)
    ohp, tb, _ = y.shape
    # fc1 as OH//2 accumulated dots: no flatten relayout needed — the PyTorch
    # NCHW flatten order is pre-absorbed into w1_ref's row permutation.
    h = jnp.zeros((tb, w1_ref.shape[-1]), jnp.float32)
    for r in range(ohp):
        h = h + jnp.dot(y[r], w1_ref[r, :, :], preferred_element_type=jnp.float32)
    h = jnp.maximum(h + b1_ref[...], 0.0)                     # fc1 + ReLU
    z = jnp.dot(h, w2_ref[...], preferred_element_type=jnp.float32) + b2_ref[...]
    m = jnp.max(z, axis=-1, keepdims=True)                    # log_softmax
    s = z - m
    lse = jnp.log(jnp.sum(jnp.exp(s), axis=-1, keepdims=True))
    o_ref[...] = s - lse


def conv2_mlp_head(a_hmaj, wc, bc, w1, b1, w2, b2, *, batch_tile):
    """a_hmaj: (H2, N_pad, W2*Cin2) conv1 output in H-major lane-dense layout.
    Returns (N_pad, n_classes) log-probabilities."""
    h_in, n_pad, k_in = a_hmaj.shape
    cout, cin, kh, kw = wc.shape
    assert k_in % cin == 0 and n_pad % batch_tile == 0
    w_in = k_in // cin
    oh, ow = h_in - kh + 1, w_in - kw + 1
    ohp, owp = oh // 2, ow // 2
    nl = owp * cout                                  # 80
    n_hidden = w1.shape[0]                           # 50
    n_cls = w2.shape[0]                              # 10
    assert w1.shape[1] == cout * ohp * owp

    te = _conv_toeplitz(wc, w_in, 0)
    to = _conv_toeplitz(wc, w_in, 1)
    bcr = jnp.tile(bc.astype(jnp.float32), owp).reshape(1, nl)
    # fc1 weight permuted so rows follow the kernel's (oy, ox, cout) layout
    # (PyTorch flatten index is co*ohp*owp + oy*owp + ox).
    w1r = (w1.astype(jnp.float32)
             .reshape(n_hidden, cout, ohp, owp)
             .transpose(2, 3, 1, 0)                  # (oy, ox, co, hidden)
             .reshape(ohp, owp * cout, n_hidden))
    b1r = b1.reshape(1, n_hidden).astype(jnp.float32)
    w2t = w2.T.astype(jnp.float32)                   # (n_hidden, n_cls)
    b2r = b2.reshape(1, n_cls).astype(jnp.float32)

    grid = (n_pad // batch_tile,)
    flops = (2 * 2 * kh * (oh * n_pad) * k_in * nl
             + 2 * n_pad * (cout * ohp * owp * n_hidden + n_hidden * n_cls))
    transcendentals = n_pad * (n_cls + 1)
    bytes_accessed = 4 * (h_in * n_pad * k_in + 2 * te.size + w1r.size
                          + w2t.size + n_pad * n_cls)

    return pl.pallas_call(
        _conv2_head_kernel,
        out_shape=jax.ShapeDtypeStruct((n_pad, n_cls), jnp.float32),
        grid=grid,
        in_specs=[
            pl.BlockSpec((h_in, batch_tile, k_in), lambda i: (0, i, 0)),
            pl.BlockSpec((kh, k_in, nl), lambda i: (0, 0, 0)),
            pl.BlockSpec((kh, k_in, nl), lambda i: (0, 0, 0)),
            pl.BlockSpec((1, nl), lambda i: (0, 0)),
            pl.BlockSpec((ohp, owp * cout, n_hidden), lambda i: (0, 0, 0)),
            pl.BlockSpec((1, n_hidden), lambda i: (0, 0)),
            pl.BlockSpec((n_hidden, n_cls), lambda i: (0, 0)),
            pl.BlockSpec((1, n_cls), lambda i: (0, 0)),
        ],
        out_specs=pl.BlockSpec((batch_tile, n_cls), lambda i: (i, 0)),
        compiler_params=pltpu.CompilerParams(dimension_semantics=("parallel",)),
        cost_estimate=pl.CostEstimate(flops=flops, transcendentals=transcendentals,
                                      bytes_accessed=bytes_accessed),
    )(a_hmaj, te, to, bcr, w1r, b1r, w2t, b2r)


# ------------------------------ model glue ----------------------------------

def init_params(key):
    ks = jax.random.split(key, 8)
    s = 0.1
    return {
        # PyTorch conventions: conv (out_ch, in_ch, kh, kw), linear (out, in)
        "conv1_w": s * jax.random.normal(ks[0], (10, 1, 5, 5), jnp.float32),
        "conv1_b": s * jax.random.normal(ks[1], (10,), jnp.float32),
        "conv2_w": s * jax.random.normal(ks[2], (20, 10, 5, 5), jnp.float32),
        "conv2_b": s * jax.random.normal(ks[3], (20,), jnp.float32),
        "fc1_w":   s * jax.random.normal(ks[4], (50, 320), jnp.float32),
        "fc1_b":   s * jax.random.normal(ks[5], (50,), jnp.float32),
        "fc2_w":   s * jax.random.normal(ks[6], (10, 50), jnp.float32),
        "fc2_b":   s * jax.random.normal(ks[7], (10,), jnp.float32),
    }


def convnet_forward(params, x_nchw, *, block_batch=128):
    """x_nchw: (N, 1, 28, 28) float32 — same convention as the PyTorch module."""
    n, cin, h, w = x_nchw.shape
    assert cin == 1
    tile, n_pad = _batch_tile(n, block_batch)

    x = x_nchw.reshape(n, h, w).astype(jnp.float32)
    x = jnp.transpose(x, (1, 0, 2))                    # H-major: (H, N, W)
    if n_pad != n:
        x = jnp.pad(x, ((0, 0), (0, n_pad - n), (0, 0)))

    a = conv1_pool_relu(x, params["conv1_w"], params["conv1_b"],
                        batch_tile=tile)               # (12, N_pad, 120)
    out = conv2_mlp_head(a, params["conv2_w"], params["conv2_b"],
                         params["fc1_w"], params["fc1_b"],
                         params["fc2_w"], params["fc2_b"],
                         batch_tile=tile)              # (N_pad, 10)
    return out[:n]                                     # (N, 10) log-probs


def _reference_forward(params, x_nchw):
    """Pure-XLA reference of the same PyTorch module (numerical check)."""
    def conv(x, w, b):
        y = jax.lax.conv_general_dilated(
            x, w, window_strides=(1, 1), padding="VALID",
            dimension_numbers=("NCHW", "OIHW", "NCHW"))
        return y + b[None, :, None, None]

    def pool(x):
        return jax.lax.reduce_window(x, -jnp.inf, jax.lax.max,
                                     (1, 1, 2, 2), (1, 1, 2, 2), "VALID")

    y = jax.nn.relu(pool(conv(x_nchw, params["conv1_w"], params["conv1_b"])))
    y = jax.nn.relu(pool(conv(y, params["conv2_w"], params["conv2_b"])))
    flat = y.reshape(y.shape[0], -1)
    h = jax.nn.relu(flat @ params["fc1_w"].T + params["fc1_b"])
    z = h @ params["fc2_w"].T + params["fc2_b"]
    return jax.nn.log_softmax(z, axis=-1)


# -------------------------------- main ---------------------------------------

if __name__ == "__main__":
    key = jax.random.PRNGKey(0)
    k_params, k_x = jax.random.split(key)
    params = init_params(k_params)
    # Forward implies 28x28 single-channel input (flatten size 20*4*4 = 320)
    x = jax.random.normal(k_x, (2, 1, 28, 28), jnp.float32)

    fwd = jax.jit(convnet_forward)
    out = jax.block_until_ready(fwd(params, x))
    assert out.shape == (2, 10)

    # Numerical sanity check against the pure-XLA reference implementation.
    # Tolerance allows for MXU f32 accumulation-order / rounding differences.
    ref = jax.block_until_ready(_reference_forward(params, x))
    max_err = float(jnp.max(jnp.abs(out - ref)))
    assert max_err < 5e-3, f"mismatch vs reference: {max_err}"

    print("KERNEL_OK")
</pallas_src>

<mosaic_0001>
module attributes {stable_mosaic.version = 11 : i64} {
  func.func @_conv1_kernel(%arg0: i32, %arg1: memref<28x8x28xf32, #tpu.memory_space<vmem>>, %arg2: memref<5x28x120xf32, #tpu.memory_space<vmem>>, %arg3: memref<5x28x120xf32, #tpu.memory_space<vmem>>, %arg4: memref<1x120xf32, #tpu.memory_space<vmem>>, %arg5: memref<12x8x120xf32, #tpu.memory_space<vmem>>) attributes {dimension_semantics = [#tpu.dimension_semantics<parallel>], iteration_bounds = array<i64: 1>, scalar_prefetch = 0 : i64, scratch_operands = 0 : i64, tpu.core_type = #tpu.core_type<tc>, window_params = [{transform_indices = @transform_0, window_bounds = array<i64: 28, 8, 28>}, {pipeline_mode = #tpu.pipeline_mode<synchronous>, transform_indices = @transform_1, window_bounds = array<i64: 5, 28, 120>}, {pipeline_mode = #tpu.pipeline_mode<synchronous>, transform_indices = @transform_2, window_bounds = array<i64: 5, 28, 120>}, {pipeline_mode = #tpu.pipeline_mode<synchronous>, transform_indices = @transform_3, window_bounds = array<i64: 1, 120>}, {transform_indices = @transform_4, window_bounds = array<i64: 12, 8, 120>}]} {
    %cst = arith.constant 0.000000e+00 : f32
    %0 = vector.broadcast %cst : f32 to vector<192x120xf32>
    %cst_0 = arith.constant 0.000000e+00 : f32
    %1 = vector.broadcast %cst_0 : f32 to vector<192x120xf32>
    %c0 = arith.constant 0 : index
    %c0_1 = arith.constant 0 : index
    %c0_2 = arith.constant 0 : index
    %2 = vector.load %arg1[%c0, %c0_1, %c0_2] : memref<28x8x28xf32, #tpu.memory_space<vmem>>, vector<24x8x28xf32>
    %3 = vector.shape_cast %2 : vector<24x8x28xf32> to vector<192x28xf32>
    %c0_3 = arith.constant 0 : index
    %c0_4 = arith.constant 0 : index
    %c0_5 = arith.constant 0 : index
    %4 = vector.load %arg2[%c0_3, %c0_4, %c0_5] : memref<5x28x120xf32, #tpu.memory_space<vmem>>, vector<1x28x120xf32>
    %5 = vector.shape_cast %4 : vector<1x28x120xf32> to vector<28x120xf32>
    %cst_6 = arith.constant dense<0.000000e+00> : vector<192x120xf32>
    %6 = tpu.matmul %3, %5, %cst_6 {dimension_numbers = #tpu.dot_dimension_numbers<[1], [0], [0], [1], [0, 0, 1, 1], [], []>} : vector<192x28xf32>, vector<28x120xf32>, vector<192x120xf32> -> vector<192x120xf32>
    %7 = arith.addf %0, %6 : vector<192x120xf32>
    %c0_7 = arith.constant 0 : index
    %c0_8 = arith.constant 0 : index
    %c0_9 = arith.constant 0 : index
    %8 = vector.load %arg3[%c0_7, %c0_8, %c0_9] : memref<5x28x120xf32, #tpu.memory_space<vmem>>, vector<1x28x120xf32>
    %9 = vector.shape_cast %8 : vector<1x28x120xf32> to vector<28x120xf32>
    %cst_10 = arith.constant dense<0.000000e+00> : vector<192x120xf32>
    %10 = tpu.matmul %3, %9, %cst_10 {dimension_numbers = #tpu.dot_dimension_numbers<[1], [0], [0], [1], [0, 0, 1, 1], [], []>} : vector<192x28xf32>, vector<28x120xf32>, vector<192x120xf32> -> vector<192x120xf32>
    %11 = arith.addf %1, %10 : vector<192x120xf32>
    %c1 = arith.constant 1 : index
    %c0_11 = arith.constant 0 : index
    %c0_12 = arith.constant 0 : index
    %12 = vector.load %arg1[%c1, %c0_11, %c0_12] : memref<28x8x28xf32, #tpu.memory_space<vmem>>, vector<24x8x28xf32>
    %13 = vector.shape_cast %12 : vector<24x8x28xf32> to vector<192x28xf32>
    %c1_13 = arith.constant 1 : index
    %c0_14 = arith.constant 0 : index
    %c0_15 = arith.constant 0 : index
    %14 = vector.load %arg2[%c1_13, %c0_14, %c0_15] : memref<5x28x120xf32, #tpu.memory_space<vmem>>, vector<1x28x120xf32>
    %15 = vector.shape_cast %14 : vector<1x28x120xf32> to vector<28x120xf32>
    %cst_16 = arith.constant dense<0.000000e+00> : vector<192x120xf32>
    %16 = tpu.matmul %13, %15, %cst_16 {dimension_numbers = #tpu.dot_dimension_numbers<[1], [0], [0], [1], [0, 0, 1, 1], [], []>} : vector<192x28xf32>, vector<28x120xf32>, vector<192x120xf32> -> vector<192x120xf32>
    %17 = arith.addf %7, %16 : vector<192x120xf32>
    %c1_17 = arith.constant 1 : index
    %c0_18 = arith.constant 0 : index
    %c0_19 = arith.constant 0 : index
    %18 = vector.load %arg3[%c1_17, %c0_18, %c0_19] : memref<5x28x120xf32, #tpu.memory_space<vmem>>, vector<1x28x120xf32>
    %19 = vector.shape_cast %18 : vector<1x28x120xf32> to vector<28x120xf32>
    %cst_20 = arith.constant dense<0.000000e+00> : vector<192x120xf32>
    %20 = tpu.matmul %13, %19, %cst_20 {dimension_numbers = #tpu.dot_dimension_numbers<[1], [0], [0], [1], [0, 0, 1, 1], [], []>} : vector<192x28xf32>, vector<28x120xf32>, vector<192x120xf32> -> vector<192x120xf32>
    %21 = arith.addf %11, %20 : vector<192x120xf32>
    %c2 = arith.constant 2 : index
    %c0_21 = arith.constant 0 : index
    %c0_22 = arith.constant 0 : index
    %22 = vector.load %arg1[%c2, %c0_21, %c0_22] : memref<28x8x28xf32, #tpu.memory_space<vmem>>, vector<24x8x28xf32>
    %23 = vector.shape_cast %22 : vector<24x8x28xf32> to vector<192x28xf32>
    %c2_23 = arith.constant 2 : index
    %c0_24 = arith.constant 0 : index
    %c0_25 = arith.constant 0 : index
    %24 = vector.load %arg2[%c2_23, %c0_24, %c0_25] : memref<5x28x120xf32, #tpu.memory_space<vmem>>, vector<1x28x120xf32>
    %25 = vector.shape_cast %24 : vector<1x28x120xf32> to vector<28x120xf32>
    %cst_26 = arith.constant dense<0.000000e+00> : vector<192x120xf32>
    %26 = tpu.matmul %23, %25, %cst_26 {dimension_numbers = #tpu.dot_dimension_numbers<[1], [0], [0], [1], [0, 0, 1, 1], [], []>} : vector<192x28xf32>, vector<28x120xf32>, vector<192x120xf32> -> vector<192x120xf32>
    %27 = arith.addf %17, %26 : vector<192x120xf32>
    %c2_27 = arith.constant 2 : index
    %c0_28 = arith.constant 0 : index
    %c0_29 = arith.constant 0 : index
    %28 = vector.load %arg3[%c2_27, %c0_28, %c0_29] : memref<5x28x120xf32, #tpu.memory_space<vmem>>, vector<1x28x120xf32>
    %29 = vector.shape_cast %28 : vector<1x28x120xf32> to vector<28x120xf32>
    %cst_30 = arith.constant dense<0.000000e+00> : vector<192x120xf32>
    %30 = tpu.matmul %23, %29, %cst_30 {dimension_numbers = #tpu.dot_dimension_numbers<[1], [0], [0], [1], [0, 0, 1, 1], [], []>} : vector<192x28xf32>, vector<28x120xf32>, vector<192x120xf32> -> vector<192x120xf32>
    %31 = arith.addf %21, %30 : vector<192x120xf32>
    %c3 = arith.constant 3 : index
    %c0_31 = arith.constant 0 : index
    %c0_32 = arith.constant 0 : index
    %32 = vector.load %arg1[%c3, %c0_31, %c0_32] : memref<28x8x28xf32, #tpu.memory_space<vmem>>, vector<24x8x28xf32>
    %33 = vector.shape_cast %32 : vector<24x8x28xf32> to vector<192x28xf32>
    %c3_33 = arith.constant 3 : index
    %c0_34 = arith.constant 0 : index
    %c0_35 = arith.constant 0 : index
    %34 = vector.load %arg2[%c3_33, %c0_34, %c0_35] : memref<5x28x120xf32, #tpu.memory_space<vmem>>, vector<1x28x120xf32>
    %35 = vector.shape_cast %34 : vector<1x28x120xf32> to vector<28x120xf32>
    %cst_36 = arith.constant dense<0.000000e+00> : vector<192x120xf32>
    %36 = tpu.matmul %33, %35, %cst_36 {dimension_numbers = #tpu.dot_dimension_numbers<[1], [0], [0], [1], [0, 0, 1, 1], [], []>} : vector<192x28xf32>, vector<28x120xf32>, vector<192x120xf32> -> vector<192x120xf32>
    %37 = arith.addf %27, %36 : vector<192x120xf32>
    %c3_37 = arith.constant 3 : index
    %c0_38 = arith.constant 0 : index
    %c0_39 = arith.constant 0 : index
    %38 = vector.load %arg3[%c3_37, %c0_38, %c0_39] : memref<5x28x120xf32, #tpu.memory_space<vmem>>, vector<1x28x120xf32>
    %39 = vector.shape_cast %38 : vector<1x28x120xf32> to vector<28x120xf32>
    %cst_40 = arith.constant dense<0.000000e+00> : vector<192x120xf32>
    %40 = tpu.matmul %33, %39, %cst_40 {dimension_numbers = #tpu.dot_dimension_numbers<[1], [0], [0], [1], [0, 0, 1, 1], [], []>} : vector<192x28xf32>, vector<28x120xf32>, vector<192x120xf32> -> vector<192x120xf32>
    %41 = arith.addf %31, %40 : vector<192x120xf32>
    %c4 = arith.constant 4 : index
    %c0_41 = arith.constant 0 : index
    %c0_42 = arith.constant 0 : index
    %42 = vector.load %arg1[%c4, %c0_41, %c0_42] : memref<28x8x28xf32, #tpu.memory_space<vmem>>, vector<24x8x28xf32>
    %43 = vector.shape_cast %42 : vector<24x8x28xf32> to vector<192x28xf32>
    %c4_43 = arith.constant 4 : index
    %c0_44 = arith.constant 0 : index
    %c0_45 = arith.constant 0 : index
    %44 = vector.load %arg2[%c4_43, %c0_44, %c0_45] : memref<5x28x120xf32, #tpu.memory_space<vmem>>, vector<1x28x120xf32>
    %45 = vector.shape_cast %44 : vector<1x28x120xf32> to vector<28x120xf32>
    %cst_46 = arith.constant dense<0.000000e+00> : vector<192x120xf32>
    %46 = tpu.matmul %43, %45, %cst_46 {dimension_numbers = #tpu.dot_dimension_numbers<[1], [0], [0], [1], [0, 0, 1, 1], [], []>} : vector<192x28xf32>, vector<28x120xf32>, vector<192x120xf32> -> vector<192x120xf32>
    %47 = arith.addf %37, %46 : vector<192x120xf32>
    %c4_47 = arith.constant 4 : index
    %c0_48 = arith.constant 0 : index
    %c0_49 = arith.constant 0 : index
    %48 = vector.load %arg3[%c4_47, %c0_48, %c0_49] : memref<5x28x120xf32, #tpu.memory_space<vmem>>, vector<1x28x120xf32>
    %49 = vector.shape_cast %48 : vector<1x28x120xf32> to vector<28x120xf32>
    %cst_50 = arith.constant dense<0.000000e+00> : vector<192x120xf32>
    %50 = tpu.matmul %43, %49, %cst_50 {dimension_numbers = #tpu.dot_dimension_numbers<[1], [0], [0], [1], [0, 0, 1, 1], [], []>} : vector<192x28xf32>, vector<28x120xf32>, vector<192x120xf32> -> vector<192x120xf32>
    %51 = arith.addf %41, %50 : vector<192x120xf32>
    %52 = arith.maximumf %47, %51 : vector<192x120xf32>
    %53 = vector.shape_cast %52 : vector<192x120xf32> to vector<12x2x8x120xf32>
    %54 = vector.extract_strided_slice %53 {offsets = [0, 0, 0, 0], sizes = [12, 1, 8, 120], strides = [1, 1, 1, 1]} : vector<12x2x8x120xf32> to vector<12x1x8x120xf32>
    %55 = vector.shape_cast %54 : vector<12x1x8x120xf32> to vector<12x8x120xf32>
    %56 = vector.extract_strided_slice %53 {offsets = [0, 1, 0, 0], sizes = [12, 1, 8, 120], strides = [1, 1, 1, 1]} : vector<12x2x8x120xf32> to vector<12x1x8x120xf32>
    %57 = vector.shape_cast %56 : vector<12x1x8x120xf32> to vector<12x8x120xf32>
    %58 = arith.maximumf %55, %57 : vector<12x8x120xf32>
    %c0_51 = arith.constant 0 : index
    %c0_52 = arith.constant 0 : index
    %59 = vector.load %arg4[%c0_51, %c0_52] : memref<1x120xf32, #tpu.memory_space<vmem>>, vector<1x120xf32>
    %60 = vector.shape_cast %59 : vector<1x120xf32> to vector<1x1x120xf32>
    %61 = vector.broadcast %60 : vector<1x1x120xf32> to vector<12x8x120xf32>
    %62 = arith.addf %58, %61 : vector<12x8x120xf32>
    %cst_53 = arith.constant 0.000000e+00 : f32
    %63 = vector.broadcast %cst_53 : f32 to vector<12x8x120xf32>
    %64 = arith.maximumf %62, %63 : vector<12x8x120xf32>
    %c0_54 = arith.constant 0 : index
    %c0_55 = arith.constant 0 : index
    %c0_56 = arith.constant 0 : index
    %65 = vector.load %arg5[%c0_54, %c0_55, %c0_56] : memref<12x8x120xf32, #tpu.memory_space<vmem>>, vector<12x8x120xf32>
    tpu.vector_store %arg5[%c0_54, %c0_55, %c0_56], %64 {strides = array<i32>} : memref<12x8x120xf32, #tpu.memory_space<vmem>>, vector<12x8x120xf32>,
    return
  }
  func.func @transform_0(%arg0: i32) -> (i32, i32, i32) {
    %c0_i32 = arith.constant 0 : i32
    %c0_i32_0 = arith.constant 0 : i32
    %c0_i32_1 = arith.constant 0 : i32
    return %c0_i32, %arg0, %c0_i32_0 : i32, i32, i32
  }
  func.func @transform_1(%arg0: i32) -> (i32, i32, i32) {
    %c0_i32 = arith.constant 0 : i32
    %c0_i32_0 = arith.constant 0 : i32
    %c0_i32_1 = arith.constant 0 : i32
    %c0_i32_2 = arith.constant 0 : i32
    return %c0_i32, %c0_i32_0, %c0_i32_1 : i32, i32, i32
  }
  func.func @transform_2(%arg0: i32) -> (i32, i32, i32) {
    %c0_i32 = arith.constant 0 : i32
    %c0_i32_0 = arith.constant 0 : i32
    %c0_i32_1 = arith.constant 0 : i32
    %c0_i32_2 = arith.constant 0 : i32
    return %c0_i32, %c0_i32_0, %c0_i32_1 : i32, i32, i32
  }
  func.func @transform_3(%arg0: i32) -> (i32, i32) {
    %c0_i32 = arith.constant 0 : i32
    %c0_i32_0 = arith.constant 0 : i32
    %c0_i32_1 = arith.constant 0 : i32
    return %c0_i32, %c0_i32_0 : i32, i32
  }
  func.func @transform_4(%arg0: i32) -> (i32, i32, i32) {
    %c0_i32 = arith.constant 0 : i32
    %c0_i32_0 = arith.constant 0 : i32
    %c0_i32_1 = arith.constant 0 : i32
    return %c0_i32, %arg0, %c0_i32_0 : i32, i32, i32
  }
}

module attributes {stable_mosaic.version = 11 : i64} {
  func.func @_conv2_head_kernel(%arg0: i32, %arg1: memref<12x8x120xf32, #tpu.memory_space<vmem>>, %arg2: memref<5x120x80xf32, #tpu.memory_space<vmem>>, %arg3: memref<5x120x80xf32, #tpu.memory_space<vmem>>, %arg4: memref<1x80xf32, #tpu.memory_space<vmem>>, %arg5: memref<4x80x50xf32, #tpu.memory_space<vmem>>, %arg6: memref<1x50xf32, #tpu.memory_space<vmem>>, %arg7: memref<50x10xf32, #tpu.memory_space<vmem>>, %arg8: memref<1x10xf32, #tpu.memory_space<vmem>>, %arg9: memref<8x10xf32, #tpu.memory_space<vmem>>) attributes {dimension_semantics = [#tpu.dimension_semantics<parallel>], iteration_bounds = array<i64: 1>, scalar_prefetch = 0 : i64, scratch_operands = 0 : i64, tpu.core_type = #tpu.core_type<tc>, window_params = [{transform_indices = @transform_0, window_bounds = array<i64: 12, 8, 120>}, {pipeline_mode = #tpu.pipeline_mode<synchronous>, transform_indices = @transform_1, window_bounds = array<i64: 5, 120, 80>}, {pipeline_mode = #tpu.pipeline_mode<synchronous>, transform_indices = @transform_2, window_bounds = array<i64: 5, 120, 80>}, {pipeline_mode = #tpu.pipeline_mode<synchronous>, transform_indices = @transform_3, window_bounds = array<i64: 1, 80>}, {pipeline_mode = #tpu.pipeline_mode<synchronous>, transform_indices = @transform_4, window_bounds = array<i64: 4, 80, 50>}, {pipeline_mode = #tpu.pipeline_mode<synchronous>, transform_indices = @transform_5, window_bounds = array<i64: 1, 50>}, {pipeline_mode = #tpu.pipeline_mode<synchronous>, transform_indices = @transform_6, window_bounds = array<i64: 50, 10>}, {pipeline_mode = #tpu.pipeline_mode<synchronous>, transform_indices = @transform_7, window_bounds = array<i64: 1, 10>}, {transform_indices = @transform_8, window_bounds = array<i64: 8, 10>}]} {
    %cst = arith.constant 0.000000e+00 : f32
    %0 = vector.broadcast %cst : f32 to vector<64x80xf32>
    %cst_0 = arith.constant 0.000000e+00 : f32
    %1 = vector.broadcast %cst_0 : f32 to vector<64x80xf32>
    %c0 = arith.constant 0 : index
    %c0_1 = arith.constant 0 : index
    %c0_2 = arith.constant 0 : index
    %2 = vector.load %arg1[%c0, %c0_1, %c0_2] : memref<12x8x120xf32, #tpu.memory_space<vmem>>, vector<8x8x120xf32>
    %3 = vector.shape_cast %2 : vector<8x8x120xf32> to vector<64x120xf32>
    %c0_3 = arith.constant 0 : index
    %c0_4 = arith.constant 0 : index
    %c0_5 = arith.constant 0 : index
    %4 = vector.load %arg2[%c0_3, %c0_4, %c0_5] : memref<5x120x80xf32, #tpu.memory_space<vmem>>, vector<1x120x80xf32>
    %5 = vector.shape_cast %4 : vector<1x120x80xf32> to vector<120x80xf32>
    %cst_6 = arith.constant dense<0.000000e+00> : vector<64x80xf32>
    %6 = tpu.matmul %3, %5, %cst_6 {dimension_numbers = #tpu.dot_dimension_numbers<[1], [0], [0], [1], [0, 0, 1, 1], [], []>} : vector<64x120xf32>, vector<120x80xf32>, vector<64x80xf32> -> vector<64x80xf32>
    %7 = arith.addf %0, %6 : vector<64x80xf32>
    %c0_7 = arith.constant 0 : index
    %c0_8 = arith.constant 0 : index
    %c0_9 = arith.constant 0 : index
    %8 = vector.load %arg3[%c0_7, %c0_8, %c0_9] : memref<5x120x80xf32, #tpu.memory_space<vmem>>, vector<1x120x80xf32>
    %9 = vector.shape_cast %8 : vector<1x120x80xf32> to vector<120x80xf32>
    %cst_10 = arith.constant dense<0.000000e+00> : vector<64x80xf32>
    %10 = tpu.matmul %3, %9, %cst_10 {dimension_numbers = #tpu.dot_dimension_numbers<[1], [0], [0], [1], [0, 0, 1, 1], [], []>} : vector<64x120xf32>, vector<120x80xf32>, vector<64x80xf32> -> vector<64x80xf32>
    %11 = arith.addf %1, %10 : vector<64x80xf32>
    %c1 = arith.constant 1 : index
    %c0_11 = arith.constant 0 : index
    %c0_12 = arith.constant 0 : index
    %12 = vector.load %arg1[%c1, %c0_11, %c0_12] : memref<12x8x120xf32, #tpu.memory_space<vmem>>, vector<8x8x120xf32>
    %13 = vector.shape_cast %12 : vector<8x8x120xf32> to vector<64x120xf32>
    %c1_13 = arith.constant 1 : index
    %c0_14 = arith.constant 0 : index
    %c0_15 = arith.constant 0 : index
    %14 = vector.load %arg2[%c1_13, %c0_14, %c0_15] : memref<5x120x80xf32, #tpu.memory_space<vmem>>, vector<1x120x80xf32>
    %15 = vector.shape_cast %14 : vector<1x120x80xf32> to vector<120x80xf32>
    %cst_16 = arith.constant dense<0.000000e+00> : vector<64x80xf32>
    %16 = tpu.matmul %13, %15, %cst_16 {dimension_numbers = #tpu.dot_dimension_numbers<[1], [0], [0], [1], [0, 0, 1, 1], [], []>} : vector<64x120xf32>, vector<120x80xf32>, vector<64x80xf32> -> vector<64x80xf32>
    %17 = arith.addf %7, %16 : vector<64x80xf32>
    %c1_17 = arith.constant 1 : index
    %c0_18 = arith.constant 0 : index
    %c0_19 = arith.constant 0 : index
    %18 = vector.load %arg3[%c1_17, %c0_18, %c0_19] : memref<5x120x80xf32, #tpu.memory_space<vmem>>, vector<1x120x80xf32>
    %19 = vector.shape_cast %18 : vector<1x120x80xf32> to vector<120x80xf32>
    %cst_20 = arith.constant dense<0.000000e+00> : vector<64x80xf32>
    %20 = tpu.matmul %13, %19, %cst_20 {dimension_numbers = #tpu.dot_dimension_numbers<[1], [0], [0], [1], [0, 0, 1, 1], [], []>} : vector<64x120xf32>, vector<120x80xf32>, vector<64x80xf32> -> vector<64x80xf32>
    %21 = arith.addf %11, %20 : vector<64x80xf32>
    %c2 = arith.constant 2 : index
    %c0_21 = arith.constant 0 : index
    %c0_22 = arith.constant 0 : index
    %22 = vector.load %arg1[%c2, %c0_21, %c0_22] : memref<12x8x120xf32, #tpu.memory_space<vmem>>, vector<8x8x120xf32>
    %23 = vector.shape_cast %22 : vector<8x8x120xf32> to vector<64x120xf32>
    %c2_23 = arith.constant 2 : index
    %c0_24 = arith.constant 0 : index
    %c0_25 = arith.constant 0 : index
    %24 = vector.load %arg2[%c2_23, %c0_24, %c0_25] : memref<5x120x80xf32, #tpu.memory_space<vmem>>, vector<1x120x80xf32>
    %25 = vector.shape_cast %24 : vector<1x120x80xf32> to vector<120x80xf32>
    %cst_26 = arith.constant dense<0.000000e+00> : vector<64x80xf32>
    %26 = tpu.matmul %23, %25, %cst_26 {dimension_numbers = #tpu.dot_dimension_numbers<[1], [0], [0], [1], [0, 0, 1, 1], [], []>} : vector<64x120xf32>, vector<120x80xf32>, vector<64x80xf32> -> vector<64x80xf32>
    %27 = arith.addf %17, %26 : vector<64x80xf32>
    %c2_27 = arith.constant 2 : index
    %c0_28 = arith.constant 0 : index
    %c0_29 = arith.constant 0 : index
    %28 = vector.load %arg3[%c2_27, %c0_28, %c0_29] : memref<5x120x80xf32, #tpu.memory_space<vmem>>, vector<1x120x80xf32>
    %29 = vector.shape_cast %28 : vector<1x120x80xf32> to vector<120x80xf32>
    %cst_30 = arith.constant dense<0.000000e+00> : vector<64x80xf32>
    %30 = tpu.matmul %23, %29, %cst_30 {dimension_numbers = #tpu.dot_dimension_numbers<[1], [0], [0], [1], [0, 0, 1, 1], [], []>} : vector<64x120xf32>, vector<120x80xf32>, vector<64x80xf32> -> vector<64x80xf32>
    %31 = arith.addf %21, %30 : vector<64x80xf32>
    %c3 = arith.constant 3 : index
    %c0_31 = arith.constant 0 : index
    %c0_32 = arith.constant 0 : index
    %32 = vector.load %arg1[%c3, %c0_31, %c0_32] : memref<12x8x120xf32, #tpu.memory_space<vmem>>, vector<8x8x120xf32>
    %33 = vector.shape_cast %32 : vector<8x8x120xf32> to vector<64x120xf32>
    %c3_33 = arith.constant 3 : index
    %c0_34 = arith.constant 0 : index
    %c0_35 = arith.constant 0 : index
    %34 = vector.load %arg2[%c3_33, %c0_34, %c0_35] : memref<5x120x80xf32, #tpu.memory_space<vmem>>, vector<1x120x80xf32>
    %35 = vector.shape_cast %34 : vector<1x120x80xf32> to vector<120x80xf32>
    %cst_36 = arith.constant dense<0.000000e+00> : vector<64x80xf32>
    %36 = tpu.matmul %33, %35, %cst_36 {dimension_numbers = #tpu.dot_dimension_numbers<[1], [0], [0], [1], [0, 0, 1, 1], [], []>} : vector<64x120xf32>, vector<120x80xf32>, vector<64x80xf32> -> vector<64x80xf32>
    %37 = arith.addf %27, %36 : vector<64x80xf32>
    %c3_37 = arith.constant 3 : index
    %c0_38 = arith.constant 0 : index
    %c0_39 = arith.constant 0 : index
    %38 = vector.load %arg3[%c3_37, %c0_38, %c0_39] : memref<5x120x80xf32, #tpu.memory_space<vmem>>, vector<1x120x80xf32>
    %39 = vector.shape_cast %38 : vector<1x120x80xf32> to vector<120x80xf32>
    %cst_40 = arith.constant dense<0.000000e+00> : vector<64x80xf32>
    %40 = tpu.matmul %33, %39, %cst_40 {dimension_numbers = #tpu.dot_dimension_numbers<[1], [0], [0], [1], [0, 0, 1, 1], [], []>} : vector<64x120xf32>, vector<120x80xf32>, vector<64x80xf32> -> vector<64x80xf32>
    %41 = arith.addf %31, %40 : vector<64x80xf32>
    %c4 = arith.constant 4 : index
    %c0_41 = arith.constant 0 : index
    %c0_42 = arith.constant 0 : index
    %42 = vector.load %arg1[%c4, %c0_41, %c0_42] : memref<12x8x120xf32, #tpu.memory_space<vmem>>, vector<8x8x120xf32>
    %43 = vector.shape_cast %42 : vector<8x8x120xf32> to vector<64x120xf32>
    %c4_43 = arith.constant 4 : index
    %c0_44 = arith.constant 0 : index
    %c0_45 = arith.constant 0 : index
    %44 = vector.load %arg2[%c4_43, %c0_44, %c0_45] : memref<5x120x80xf32, #tpu.memory_space<vmem>>, vector<1x120x80xf32>
    %45 = vector.shape_cast %44 : vector<1x120x80xf32> to vector<120x80xf32>
    %cst_46 = arith.constant dense<0.000000e+00> : vector<64x80xf32>
    %46 = tpu.matmul %43, %45, %cst_46 {dimension_numbers = #tpu.dot_dimension_numbers<[1], [0], [0], [1], [0, 0, 1, 1], [], []>} : vector<64x120xf32>, vector<120x80xf32>, vector<64x80xf32> -> vector<64x80xf32>
    %47 = arith.addf %37, %46 : vector<64x80xf32>
    %c4_47 = arith.constant 4 : index
    %c0_48 = arith.constant 0 : index
    %c0_49 = arith.constant 0 : index
    %48 = vector.load %arg3[%c4_47, %c0_48, %c0_49] : memref<5x120x80xf32, #tpu.memory_space<vmem>>, vector<1x120x80xf32>
    %49 = vector.shape_cast %48 : vector<1x120x80xf32> to vector<120x80xf32>
    %cst_50 = arith.constant dense<0.000000e+00> : vector<64x80xf32>
    %50 = tpu.matmul %43, %49, %cst_50 {dimension_numbers = #tpu.dot_dimension_numbers<[1], [0], [0], [1], [0, 0, 1, 1], [], []>} : vector<64x120xf32>, vector<120x80xf32>, vector<64x80xf32> -> vector<64x80xf32>
    %51 = arith.addf %41, %50 : vector<64x80xf32>
    %52 = arith.maximumf %47, %51 : vector<64x80xf32>
    %53 = vector.shape_cast %52 : vector<64x80xf32> to vector<4x2x8x80xf32>
    %54 = vector.extract_strided_slice %53 {offsets = [0, 0, 0, 0], sizes = [4, 1, 8, 80], strides = [1, 1, 1, 1]} : vector<4x2x8x80xf32> to vector<4x1x8x80xf32>
    %55 = vector.shape_cast %54 : vector<4x1x8x80xf32> to vector<4x8x80xf32>
    %56 = vector.extract_strided_slice %53 {offsets = [0, 1, 0, 0], sizes = [4, 1, 8, 80], strides = [1, 1, 1, 1]} : vector<4x2x8x80xf32> to vector<4x1x8x80xf32>
    %57 = vector.shape_cast %56 : vector<4x1x8x80xf32> to vector<4x8x80xf32>
    %58 = arith.maximumf %55, %57 : vector<4x8x80xf32>
    %c0_51 = arith.constant 0 : index
    %c0_52 = arith.constant 0 : index
    %59 = vector.load %arg4[%c0_51, %c0_52] : memref<1x80xf32, #tpu.memory_space<vmem>>, vector<1x80xf32>
    %60 = vector.shape_cast %59 : vector<1x80xf32> to vector<1x1x80xf32>
    %61 = vector.broadcast %60 : vector<1x1x80xf32> to vector<4x8x80xf32>
    %62 = arith.addf %58, %61 : vector<4x8x80xf32>
    %cst_53 = arith.constant 0.000000e+00 : f32
    %63 = vector.broadcast %cst_53 : f32 to vector<4x8x80xf32>
    %64 = arith.maximumf %62, %63 : vector<4x8x80xf32>
    %cst_54 = arith.constant 0.000000e+00 : f32
    %65 = vector.broadcast %cst_54 : f32 to vector<8x50xf32>
    %66 = vector.extract_strided_slice %64 {offsets = [0, 0, 0], sizes = [1, 8, 80], strides = [1, 1, 1]} : vector<4x8x80xf32> to vector<1x8x80xf32>
    %67 = vector.shape_cast %66 : vector<1x8x80xf32> to vector<8x80xf32>
    %c0_55 = arith.constant 0 : index
    %c0_56 = arith.constant 0 : index
    %c0_57 = arith.constant 0 : index
    %68 = vector.load %arg5[%c0_55, %c0_56, %c0_57] : memref<4x80x50xf32, #tpu.memory_space<vmem>>, vector<1x80x50xf32>
    %69 = vector.shape_cast %68 : vector<1x80x50xf32> to vector<80x50xf32>
    %cst_58 = arith.constant dense<0.000000e+00> : vector<8x50xf32>
    %70 = tpu.matmul %67, %69, %cst_58 {dimension_numbers = #tpu.dot_dimension_numbers<[1], [0], [0], [1], [0, 0, 1, 1], [], []>} : vector<8x80xf32>, vector<80x50xf32>, vector<8x50xf32> -> vector<8x50xf32>
    %71 = arith.addf %65, %70 : vector<8x50xf32>
    %72 = vector.extract_strided_slice %64 {offsets = [1, 0, 0], sizes = [1, 8, 80], strides = [1, 1, 1]} : vector<4x8x80xf32> to vector<1x8x80xf32>
    %73 = vector.shape_cast %72 : vector<1x8x80xf32> to vector<8x80xf32>
    %c1_59 = arith.constant 1 : index
    %c0_60 = arith.constant 0 : index
    %c0_61 = arith.constant 0 : index
    %74 = vector.load %arg5[%c1_59, %c0_60, %c0_61] : memref<4x80x50xf32, #tpu.memory_space<vmem>>, vector<1x80x50xf32>
    %75 = vector.shape_cast %74 : vector<1x80x50xf32> to vector<80x50xf32>
    %cst_62 = arith.constant dense<0.000000e+00> : vector<8x50xf32>
    %76 = tpu.matmul %73, %75, %cst_62 {dimension_numbers = #tpu.dot_dimension_numbers<[1], [0], [0], [1], [0, 0, 1, 1], [], []>} : vector<8x80xf32>, vector<80x50xf32>, vector<8x50xf32> -> vector<8x50xf32>
    %77 = arith.addf %71, %76 : vector<8x50xf32>
    %78 = vector.extract_strided_slice %64 {offsets = [2, 0, 0], sizes = [1, 8, 80], strides = [1, 1, 1]} : vector<4x8x80xf32> to vector<1x8x80xf32>
    %79 = vector.shape_cast %78 : vector<1x8x80xf32> to vector<8x80xf32>
    %c2_63 = arith.constant 2 : index
    %c0_64 = arith.constant 0 : index
    %c0_65 = arith.constant 0 : index
    %80 = vector.load %arg5[%c2_63, %c0_64, %c0_65] : memref<4x80x50xf32, #tpu.memory_space<vmem>>, vector<1x80x50xf32>
    %81 = vector.shape_cast %80 : vector<1x80x50xf32> to vector<80x50xf32>
    %cst_66 = arith.constant dense<0.000000e+00> : vector<8x50xf32>
    %82 = tpu.matmul %79, %81, %cst_66 {dimension_numbers = #tpu.dot_dimension_numbers<[1], [0], [0], [1], [0, 0, 1, 1], [], []>} : vector<8x80xf32>, vector<80x50xf32>, vector<8x50xf32> -> vector<8x50xf32>
    %83 = arith.addf %77, %82 : vector<8x50xf32>
    %84 = vector.extract_strided_slice %64 {offsets = [3, 0, 0], sizes = [1, 8, 80], strides = [1, 1, 1]} : vector<4x8x80xf32> to vector<1x8x80xf32>
    %85 = vector.shape_cast %84 : vector<1x8x80xf32> to vector<8x80xf32>
    %c3_67 = arith.constant 3 : index
    %c0_68 = arith.constant 0 : index
    %c0_69 = arith.constant 0 : index
    %86 = vector.load %arg5[%c3_67, %c0_68, %c0_69] : memref<4x80x50xf32, #tpu.memory_space<vmem>>, vector<1x80x50xf32>
    %87 = vector.shape_cast %86 : vector<1x80x50xf32> to vector<80x50xf32>
    %cst_70 = arith.constant dense<0.000000e+00> : vector<8x50xf32>
    %88 = tpu.matmul %85, %87, %cst_70 {dimension_numbers = #tpu.dot_dimension_numbers<[1], [0], [0], [1], [0, 0, 1, 1], [], []>} : vector<8x80xf32>, vector<80x50xf32>, vector<8x50xf32> -> vector<8x50xf32>
    %89 = arith.addf %83, %88 : vector<8x50xf32>
    %c0_71 = arith.constant 0 : index
    %c0_72 = arith.constant 0 : index
    %90 = vector.load %arg6[%c0_71, %c0_72] : memref<1x50xf32, #tpu.memory_space<vmem>>, vector<1x50xf32>
    %91 = vector.broadcast %90 : vector<1x50xf32> to vector<8x50xf32>
    %92 = arith.addf %89, %91 : vector<8x50xf32>
    %cst_73 = arith.constant 0.000000e+00 : f32
    %93 = vector.broadcast %cst_73 : f32 to vector<8x50xf32>
    %94 = arith.maximumf %92, %93 : vector<8x50xf32>
    %c0_74 = arith.constant 0 : index
    %c0_75 = arith.constant 0 : index
    %95 = vector.load %arg7[%c0_74, %c0_75] : memref<50x10xf32, #tpu.memory_space<vmem>>, vector<50x10xf32>
    %cst_76 = arith.constant dense<0.000000e+00> : vector<8x10xf32>
    %96 = tpu.matmul %94, %95, %cst_76 {dimension_numbers = #tpu.dot_dimension_numbers<[1], [0], [0], [1], [0, 0, 1, 1], [], []>} : vector<8x50xf32>, vector<50x10xf32>, vector<8x10xf32> -> vector<8x10xf32>
    %c0_77 = arith.constant 0 : index
    %c0_78 = arith.constant 0 : index
    %97 = vector.load %arg8[%c0_77, %c0_78] : memref<1x10xf32, #tpu.memory_space<vmem>>, vector<1x10xf32>
    %98 = vector.broadcast %97 : vector<1x10xf32> to vector<8x10xf32>
    %99 = arith.addf %96, %98 : vector<8x10xf32>
    %cst_79 = arith.constant dense<0xFF800000> : vector<8xf32>
    %100 = vector.multi_reduction <maximumf>, %99, %cst_79 [1] : vector<8x10xf32> to vector<8xf32>
    %101 = vector.shape_cast %100 : vector<8xf32> to vector<8x1xf32>
    %102 = vector.broadcast %101 : vector<8x1xf32> to vector<8x10xf32>
    %103 = arith.subf %99, %102 : vector<8x10xf32>
    %104 = math.exp %103 : vector<8x10xf32>
    %cst_80 = arith.constant dense<0.000000e+00> : vector<8xf32>
    %105 = vector.multi_reduction <add>, %104, %cst_80 [1] : vector<8x10xf32> to vector<8xf32>
    %106 = vector.shape_cast %105 : vector<8xf32> to vector<8x1xf32>
    %107 = math.log %106 : vector<8x1xf32>
    %108 = vector.broadcast %107 : vector<8x1xf32> to vector<8x10xf32>
    %109 = arith.subf %103, %108 : vector<8x10xf32>
    %c0_81 = arith.constant 0 : index
    %c0_82 = arith.constant 0 : index
    %110 = vector.load %arg9[%c0_81, %c0_82] : memref<8x10xf32, #tpu.memory_space<vmem>>, vector<8x10xf32>
    tpu.vector_store %arg9[%c0_81, %c0_82], %109 {strides = array<i32>} : memref<8x10xf32, #tpu.memory_space<vmem>>, vector<8x10xf32>,
    return
  }
  func.func @transform_0(%arg0: i32) -> (i32, i32, i32) {
    %c0_i32 = arith.constant 0 : i32
    %c0_i32_0 = arith.constant 0 : i32
    %c0_i32_1 = arith.constant 0 : i32
    return %c0_i32, %arg0, %c0_i32_0 : i32, i32, i32
  }
  func.func @transform_1(%arg0: i32) -> (i32, i32, i32) {
    %c0_i32 = arith.constant 0 : i32
    %c0_i32_0 = arith.constant 0 : i32
    %c0_i32_1 = arith.constant 0 : i32
    %c0_i32_2 = arith.constant 0 : i32
    return %c0_i32, %c0_i32_0, %c0_i32_1 : i32, i32, i32
  }
  func.func @transform_2(%arg0: i32) -> (i32, i32, i32) {
    %c0_i32 = arith.constant 0 : i32
    %c0_i32_0 = arith.constant 0 : i32
    %c0_i32_1 = arith.constant 0 : i32
    %c0_i32_2 = arith.constant 0 : i32
    return %c0_i32, %c0_i32_0, %c0_i32_1 : i32, i32, i32
  }
  func.func @transform_3(%arg0: i32) -> (i32, i32) {
    %c0_i32 = arith.constant 0 : i32
    %c0_i32_0 = arith.constant 0 : i32
    %c0_i32_1 = arith.constant 0 : i32
    return %c0_i32, %c0_i32_0 : i32, i32
  }
  func.func @transform_4(%arg0: i32) -> (i32, i32, i32) {
    %c0_i32 = arith.constant 0 : i32
    %c0_i32_0 = arith.constant 0 : i32
    %c0_i32_1 = arith.constant 0 : i32
    %c0_i32_2 = arith.constant 0 : i32
    return %c0_i32, %c0_i32_0, %c0_i32_1 : i32, i32, i32
  }
  func.func @transform_5(%arg0: i32) -> (i32, i32) {
    %c0_i32 = arith.constant 0 : i32
    %c0_i32_0 = arith.constant 0 : i32
    %c0_i32_1 = arith.constant 0 : i32
    return %c0_i32, %c0_i32_0 : i32, i32
  }
  func.func @transform_6(%arg0: i32) -> (i32, i32) {
    %c0_i32 = arith.constant 0 : i32
    %c0_i32_0 = arith.constant 0 : i32
    %c0_i32_1 = arith.constant 0 : i32
    return %c0_i32, %c0_i32_0 : i32, i32
  }
  func.func @transform_7(%arg0: i32) -> (i32, i32) {
    %c0_i32 = arith.constant 0 : i32
    %c0_i32_0 = arith.constant 0 : i32
    %c0_i32_1 = arith.constant 0 : i32
    return %c0_i32, %c0_i32_0 : i32, i32
  }
  func.func @transform_8(%arg0: i32) -> (i32, i32) {
    %c0_i32 = arith.constant 0 : i32
    %c0_i32_0 = arith.constant 0 : i32
    return %arg0, %c0_i32 : i32, i32
  }
}

</mosaic_0001>

<bundles_post_ra>
// kernel: tile.13
= control target key start
LH: loop header
LB: loop body
LE: loop exit
PB: predicated region body
PF: predicated region fallthrough
CT: control target
= control target key end

     0   :  { %s28_s0 = inlined_call_operand.vmem [shape: f32[10], index: 0, kind: input, shape index: {}]   ;;  %s29_s1 = inlined_call_operand.vmem [shape: f32[12,10], index: 1, kind: output, shape index: {}]  }
   0x1   :  { %v4_v0 = vld [vmem:[%s28_s0] ss:$0 sm:$0xff] }
   0x2   :  { %5 = vst [vmem:[%s29_s1] sm:$0xff] %v4_v0  ;;  %8 = vst [vmem:[%s29_s1 + $0x8] sm:$0xff] %v4_v0 }

// kernel: tile.14
= control target key start
LH: loop header
LB: loop body
LE: loop exit
PB: predicated region body
PF: predicated region fallthrough
CT: control target
= control target key end

     0   :  { %s99_s10 = smov 110   ;;  %s100_s11 = smov 90   ;;  %vm3_vm0 = vcmask 80896   ;;  %vm9_vm1 = vcmask 982896   ;;  %vm15_vm2 = vcmask 900896   ;;  %vm21_vm3 = vcmask 818896   ;;  %s159_s0 = inlined_call_operand.vmem [shape: f32[12,10], index: 0, kind: input, shape index: {}]   ;;  %s160_s1 = inlined_call_operand.vmem [shape: f32[1,120], index: 1, kind: output, shape index: {}]  }
   0x1   :  { %v77_v0 = vld [vmem:[%s159_s0 + $0xb] sm:$0x1]   ;;  %v79_v1 = vld [vmem:[%s159_s0 + $0x9] sm:$0x1]   ;;  %v78_v2 = vld [vmem:[%s159_s0 + $0xa] sm:$0x1]  }
   0x2   :  { %7 = vrot.lane.b32.xlu0 %v77_v0, %s99_s10  ;;  %19 = vrot.lane.b32.xlu1 %v79_v1, %s100_s11  ;;  %v80_v3 = vld [vmem:[%s159_s0 + $0x8] sm:$0x1]   ;;  %s101_s16 = smov 100   ;;  %s102_s17 = smov 80   ;;  %v81_v4 = vld [vmem:[%s159_s0 + $0x7] sm:$0x1]  }
   0x3   :  { %v2_v5 = vld [vmem:[%s159_s0] sm:$0x1]   ;;  %v82_v6 = vld [vmem:[%s159_s0 + $0x6] sm:$0x1]   ;;  %s103_s24 = smov 70   ;;  %s104_s25 = smov 60  }
   0x4   :  { %4 = vst.msk [vmem:[#allocation0] sm:$0x1] %vm3_vm0, %v2_v5   ;;  %v83_v7 = vld [vmem:[%s159_s0 + $0x5] sm:$0x1]   ;;  %v84_v8 = vld [vmem:[%s159_s0 + $0x4] sm:$0x1]  }
   0x5   :  { %s105_s30 = smov 50   ;;  %s106_s2 = smov 40   ;;  %v85_v9 = vld [vmem:[%s159_s0 + $0x3] sm:$0x1]   ;;  %v86_v10 = vld [vmem:[%s159_s0 + $0x2] sm:$0x1]  }
   0x6   :  { %13 = vrot.lane.b32.xlu0 %v78_v2, %s101_s16  ;;  %25 = vrot.lane.b32.xlu1 %v80_v3, %s102_s17  ;;  %s107_s7 = smov 30   ;;  %s108_s8 = smov 20   ;;  %v87_v11 = vld [vmem:[%s159_s0 + $0x1] sm:$0x1]   ;;  %vm27_vm4 = vcmask 736896   ;;  %vm33_vm5 = vcmask 654896  }
   0x7   :  { %s109_s0 = smov 10   ;;  %vm39_vm6 = vcmask 572896   ;;  %vm45_vm7 = vcmask 490896   ;;  %vm51_vm8 = vcmask 408896   ;;  %vm57_vm9 = vcmask 326896  }
   0x8   :  { %vm63_vm10 = vcmask 244896   ;;  %vm69_vm11 = vcmask 162896  }
   0xa   :  { %31 = vrot.lane.b32.xlu0 %v81_v4, %s103_s24  ;;  %37 = vrot.lane.b32.xlu1 %v82_v6, %s104_s25 }
   0xe   :  { %43 = vrot.lane.b32.xlu0 %v83_v7, %s105_s30  ;;  %49 = vrot.lane.b32.xlu1 %v84_v8, %s106_s2 }
  0x12   :  { %55 = vrot.lane.b32.xlu0 %v85_v9, %s107_s7  ;;  %61 = vrot.lane.b32.xlu1 %v86_v10, %s108_s8 }
  0x16   :  { %67 = vrot.lane.b32.xlu0 %v87_v11, %s109_s0 }
  0x74   :  { %v8_v12 = vpop.permute.xlu0 %7   ;;  %v20_v13 = vpop.permute.xlu1 %19  }
  0x75   :  { %10 = vst.msk [vmem:[#allocation0] sm:$0x1] %vm9_vm1, %v8_v12  }
  0x78   :  { %v14_v14 = vpop.permute.xlu0 %13   ;;  %v26_v15 = vpop.permute.xlu1 %25  }
  0x79   :  { %16 = vst.msk [vmem:[#allocation0] sm:$0x1] %vm15_vm2, %v14_v14  }
  0x7a   :  { %22 = vst.msk [vmem:[#allocation0] sm:$0x1] %vm21_vm3, %v20_v13  }
  0x7b   :  { %28 = vst.msk [vmem:[#allocation0] sm:$0x1] %vm27_vm4, %v26_v15  }
  0x7c   :  { %v32_v16 = vpop.permute.xlu0 %31   ;;  %v38_v17 = vpop.permute.xlu1 %37  }
  0x7d   :  { %34 = vst.msk [vmem:[#allocation0] sm:$0x1] %vm33_vm5, %v32_v16  }
  0x7e   :  { %40 = vst.msk [vmem:[#allocation0] sm:$0x1] %vm39_vm6, %v38_v17  }
  0x80   :  { %v44_v18 = vpop.permute.xlu0 %43   ;;  %v50_v19 = vpop.permute.xlu1 %49  }
  0x81   :  { %46 = vst.msk [vmem:[#allocation0] sm:$0x1] %vm45_vm7, %v44_v18  }
  0x82   :  { %52 = vst.msk [vmem:[#allocation0] sm:$0x1] %vm51_vm8, %v50_v19  }
  0x84   :  { %v56_v20 = vpop.permute.xlu0 %55   ;;  %v62_v21 = vpop.permute.xlu1 %61  }
  0x85   :  { %58 = vst.msk [vmem:[#allocation0] sm:$0x1] %vm57_vm9, %v56_v20  }
  0x86   :  { %64 = vst.msk [vmem:[#allocation0] sm:$0x1] %vm63_vm10, %v62_v21  }
  0x88   :  { %v68_v22 = vpop.permute.xlu0 %67  }
  0x89   :  { %70 = vst.msk [vmem:[#allocation0] sm:$0x1] %vm69_vm11, %v68_v22  }
  0x90   :  { %v74_v23 = vld [vmem:[#allocation0] sm:$0x1] }
  0x91   :  { %76 = vst [vmem:[%s160_s1] sm:$0x1] %v74_v23 }

// kernel: convnet_forward.2
= control target key start
LH: loop header
LB: loop body
LE: loop exit
PB: predicated region body
PF: predicated region fallthrough
CT: control target
= control target key end

     0   :  { %vm152_vm0 = vcmask 1043456   ;;  %vm4051_vm1 = vmmov 1   ;;  %vm79_vm3 = vcmask 228352   ;;  %vm2642_vm4 = vcmask 982016   ;;  %s4920_s1 = inlined_call_operand.vmem [shape: f32[5,28,120], index: 1, kind: input, shape index: {}]   ;;  %s4921_s2 = inlined_call_operand.vmem [shape: f32[5,28,120], index: 2, kind: input, shape index: {}]   ;;  %s4922_s0 = inlined_call_operand.vmem [shape: f32[28,8,28], index: 0, kind: input, shape index: {}]   ;;  %s4923_s3 = inlined_call_operand.vmem [shape: f32[1,120], index: 3, kind: input, shape index: {}]   ;;  %s4924_s4 = inlined_call_operand.vmem [shape: f32[12,8,120], index: 4, kind: output, shape index: {}]  }
   0x1   :  { %v2683_v0 = vld [vmem:[%s4920_s1 + $0x20] sm:$0xff]  ;;  %v2684_v1 = vld [vmem:[%s4920_s1 + $0x28] sm:$0xff]  ;;  %v2685_v5 = vld [vmem:[%s4920_s1 + $0x30] sm:$0xff] }
   0x2   :  { %v2737_v2 = vld [vmem:[%s4921_s2 + $0x20] sm:$0xff]  ;;  %v3758_v3 = vpack.c.bf16 %v2684_v1, %v2683_v0  ;;  %v2738_v4 = vld [vmem:[%s4921_s2 + $0x28] sm:$0xff]  ;;  %v2686_v6 = vld [vmem:[%s4920_s1 + $0x38] sm:$0xf] }
   0x3   :  { %v3778_v7 = vpack.c.bf16 %v2738_v4, %v2737_v2  ;;  %v3762_v8 = vpack.c.bf16 %v2686_v6, %v2685_v5  ;;  %vm4095_vm2 = vmpackc.low %vm152_vm0, %vm4051_vm1  ;;  %v2739_v10 = vld [vmem:[%s4921_s2 + $0x30] sm:$0xff]  ;;  %v2740_v11 = vld [vmem:[%s4921_s2 + $0x38] sm:$0xf] }
   0x4   :  { %3759 = vmatprep.subr.bf16.mxu0 %v3758_v3  ;;  %v3782_v12 = vpack.c.bf16 %v2740_v11, %v2739_v10  ;;  %v4108_v13 = vld [vmem:[%s4922_s0 + $0x8] sm:$0xff]  ;;  %v41_v14 = vld [vmem:[%s4920_s1] sm:$0xff]  ;;  %v4135_v20 = vld [vmem:[%s4922_s0 + $0x10] sm:$0xff] }
   0x5   :  { %3779 = vmatprep.subr.bf16.mxu1 %v3778_v7  ;;  %3761 = vmatpush3.bf16.msra.mxu0 %v3758_v3  ;;  %v42_v15 = vld [vmem:[%s4920_s1 + $0x8] sm:$0xff]  ;;  %v45_v16 = vld [vmem:[%s4921_s2] sm:$0xff]  ;;  %v43_v21 = vld [vmem:[%s4920_s1 + $0x10] sm:$0xff] }
   0x6   :  { %v46_v17 = vld [vmem:[%s4921_s2 + $0x8] sm:$0xff]  ;;  %3781 = vmatpush3.bf16.msra.mxu1 %v3778_v7  ;;  %3764 = vmatprep.subr.msk.bf16.mxu0 %vm4095_vm2, %v3762_v8  ;;  %v3768_v18 = vpack.c.bf16 %v42_v15, %v41_v14  ;;  %v44_v22 = vld [vmem:[%s4920_s1 + $0x18] sm:$0xf]  ;;  %v47_v23 = vld [vmem:[%s4921_s2 + $0x10] sm:$0xff] }
   0x7   :  { %3784 = vmatprep.subr.msk.bf16.mxu1 %vm4095_vm2, %v3782_v12  ;;  %3326 = vmatprep.mubr.msk.f32.mxu0 %vm79_vm3, %v4108_v13  ;;  %v3788_v19 = vpack.c.bf16 %v46_v17, %v45_v16  ;;  %v4151_v24 = vld [vmem:[%s4922_s0 + $0x18] sm:$0xff]  ;;  %v3772_v25 = vpack.c.bf16 %v44_v22, %v43_v21  ;;  %v4163_v28 = vld [vmem:[%s4922_s0 + $0x20] sm:$0xff]  ;;  %v4170_v29 = vld [vmem:[%s4922_s0 + $0x28] sm:$0xff] }
   0x8   :  { %3414 = vmatprep.mubr.msk.f32.mxu1 %vm79_vm3, %v4108_v13  ;;  %v48_v26 = vld [vmem:[%s4921_s2 + $0x18] sm:$0xf]  ;;  %v2815_v30 = vld [vmem:[%s4920_s1 + $0x40] sm:$0xff]  ;;  %v2816_v31 = vld [vmem:[%s4920_s1 + $0x48] sm:$0xff] }
   0x9   :  { %3767 = vmatpush3.bf16.msk.msra.mxu0 %vm4095_vm2, %v3762_v8  ;;  %v3792_v27 = vpack.c.bf16 %v48_v26, %v47_v23  ;;  %v2844_v32 = vld [vmem:[%s4921_s2 + $0x40] sm:$0xff]  ;;  %v4189_v33 = vpack.c.bf16 %v2816_v31, %v2815_v30  ;;  %v2845_v34 = vld [vmem:[%s4921_s2 + $0x48] sm:$0xff]  ;;  %v4201_v35 = vld [vmem:[%s4922_s0 + $0x30] sm:$0xff] }
   0xa   :  { %3787 = vmatpush3.bf16.msk.msra.mxu1 %vm4095_vm2, %v3782_v12  ;;  %3769 = vmatprep.subr.bf16.mxu0 %v3768_v18  ;;  %v4203_v36 = vpack.c.bf16 %v2845_v34, %v2844_v32  ;;  %v4210_v37 = vld [vmem:[%s4922_s0 + $0x38] sm:$0xff]  ;;  %v4227_v38 = vld [vmem:[%s4922_s0 + $0x40] sm:$0xff]  ;;  %v4234_v39 = vld [vmem:[%s4922_s0 + $0x48] sm:$0xff] }
   0xb   :  { %3789 = vmatprep.subr.bf16.mxu1 %v3788_v19  ;;  %v4245_v40 = vld [vmem:[%s4922_s0 + $0x50] sm:$0xff]  ;;  %v4252_v41 = vld [vmem:[%s4922_s0 + $0x58] sm:$0xff]  ;;  %v4263_v42 = vld [vmem:[%s4922_s0 + $0x60] sm:$0xff] }
   0xc   :  { %3327 = vmatmul.mubr.msk.f32.vlgmr.msra.gmra.mrb[0].mxu0 %vm79_vm3, %v4135_v20  ;;  %v4270_v43 = vld [vmem:[%s4922_s0 + $0x68] sm:$0xff]  ;;  %v4281_v44 = vld [vmem:[%s4922_s0 + $0x70] sm:$0xff]  ;;  %v4288_v45 = vld [vmem:[%s4922_s0 + $0x78] sm:$0xff] }
   0xd   :  { %3415 = vmatmul.mubr.msk.f32.vlgmr.msra.gmra.mrb[0].mxu1 %vm79_vm3, %v4135_v20  ;;  %3771 = vmatpush3.bf16.msra.mxu0 %v3768_v18  ;;  %v4299_v46 = vld [vmem:[%s4922_s0 + $0x80] sm:$0xff]  ;;  %v4306_v47 = vld [vmem:[%s4922_s0 + $0x88] sm:$0xff]  ;;  %v4317_v48 = vld [vmem:[%s4922_s0 + $0x90] sm:$0xff] }
   0xe   :  { %3791 = vmatpush3.bf16.msra.mxu1 %v3788_v19  ;;  %3329 = vmatprep.mubr.msk.f32.mxu0 %vm79_vm3, %v4151_v24  ;;  %v4324_v49 = vld [vmem:[%s4922_s0 + $0x98] sm:$0xff]  ;;  %v4335_v50 = vld [vmem:[%s4922_s0 + $0xa0] sm:$0xff]  ;;  %v4342_v51 = vld [vmem:[%s4922_s0 + $0xa8] sm:$0xff] }
   0xf   :  { %3417 = vmatprep.mubr.msk.f32.mxu1 %vm79_vm3, %v4151_v24  ;;  %3774 = vmatprep.subr.msk.bf16.mxu0 %vm4095_vm2, %v3772_v25  ;;  %v4353_v52 = vld [vmem:[%s4922_s0 + $0xb0] sm:$0xff]  ;;  %v4360_v53 = vld [vmem:[%s4922_s0 + $0xb8] sm:$0xff]  ;;  %v4371_v54 = vld [vmem:[%s4922_s0 + $0xc0] sm:$0xff] }
  0x10   :  { %3330 = vmatmul.mubr.msk.f32.gmra.mrb[2].mxu0 %vm79_vm3, %v4163_v28  ;;  %3794 = vmatprep.subr.msk.bf16.mxu1 %vm4095_vm2, %v3792_v27  ;;  %v17_v55 = vld [vmem:[%s4922_s0] sm:$0xff]  ;;  %v2817_v56 = vld [vmem:[%s4920_s1 + $0x50] sm:$0xff]  ;;  %v2818_v57 = vld [vmem:[%s4920_s1 + $0x58] sm:$0xf] }
  0x11   :  { %3418 = vmatmul.mubr.msk.f32.gmra.mrb[2].mxu1 %vm79_vm3, %v4163_v28  ;;  %3332 = vmatprep.mubr.msk.f32.mxu0 %vm79_vm3, %v4170_v29  ;;  %v2846_v58 = vld [vmem:[%s4921_s2 + $0x50] sm:$0xff]  ;;  %v2847_v59 = vld [vmem:[%s4921_s2 + $0x58] sm:$0xf]  ;;  %v3802_v60 = vpack.c.bf16 %v2818_v57, %v2817_v56  ;;  %v2897_v62 = vld [vmem:[%s4920_s1 + $0x60] sm:$0xff] }
  0x12   :  { %3420 = vmatprep.mubr.msk.f32.mxu1 %vm79_vm3, %v4170_v29  ;;  %3777 = vmatpush3.bf16.msk.msra.mxu0 %vm4095_vm2, %v3772_v25  ;;  %v3812_v61 = vpack.c.bf16 %v2847_v59, %v2846_v58  ;;  %v2898_v63 = vld [vmem:[%s4920_s1 + $0x68] sm:$0xff]  ;;  %v2926_v0 = vld [vmem:[%s4921_s2 + $0x60] sm:$0xff]  ;;  %v2899_v4 = vld [vmem:[%s4920_s1 + $0x70] sm:$0xff] }
  0x13   :  { %3797 = vmatpush3.bf16.msk.msra.mxu1 %vm4095_vm2, %v3792_v27  ;;  %3799 = vmatprep.subr.bf16.mxu0 %v4189_v33  ;;  %v2927_v1 = vld [vmem:[%s4921_s2 + $0x68] sm:$0xff]  ;;  %v3818_v2 = vpack.c.bf16 %v2898_v63, %v2897_v62  ;;  %v2900_v5 = vld [vmem:[%s4920_s1 + $0x78] sm:$0xf]  ;;  %v2928_v6 = vld [vmem:[%s4921_s2 + $0x70] sm:$0xff] }
  0x14   :  { %3333 = vmatmul.mubr.msk.f32.gmra.mrb[4].mxu0 %vm79_vm3, %v4201_v35  ;;  %3809 = vmatprep.subr.bf16.mxu1 %v4203_v36  ;;  %v3828_v3 = vpack.c.bf16 %v2927_v1, %v2926_v0  ;;  %v2929_v7 = vld [vmem:[%s4921_s2 + $0x78] sm:$0xf]  ;;  %v3822_v8 = vpack.c.bf16 %v2900_v5, %v2899_v4  ;;  %v2979_v11 = vld [vmem:[%s4920_s1 + $0x80] sm:$0xff]  ;;  %v2980_v12 = vld [vmem:[%s4920_s1 + $0x88] sm:$0xff] }
  0x15   :  { %3421 = vmatmul.mubr.msk.f32.gmra.mrb[4].mxu1 %vm79_vm3, %v4201_v35  ;;  %3335 = vmatprep.mubr.msk.f32.mxu0 %vm79_vm3, %v4210_v37  ;;  %v3832_v10 = vpack.c.bf16 %v2929_v7, %v2928_v6  ;;  %v3009_v14 = vld [vmem:[%s4921_s2 + $0x88] sm:$0xff]  ;;  %v3838_v15 = vpack.c.bf16 %v2980_v12, %v2979_v11  ;;  %v2981_v18 = vld [vmem:[%s4920_s1 + $0x90] sm:$0xff]  ;;  %v2982_v19 = vld [vmem:[%s4920_s1 + $0x98] sm:$0xf] }
  0x16   :  { %3423 = vmatprep.mubr.msk.f32.mxu1 %vm79_vm3, %v4210_v37  ;;  %v4635_v17 = vld [vmem:[%s4922_s0 + $0xc8] sm:$0xff]  ;;  %v3011_v21 = vld [vmem:[%s4921_s2 + $0x98] sm:$0xf]  ;;  %v3842_v22 = vpack.c.bf16 %v2982_v19, %v2981_v18  ;;  %v2896_v9 = vld [vmem:[%s4922_s0 + $0xd0] sm:$0xff] }
  0x17   :  { %v4858_v31 = vld [vmem:[%s4923_s3] ss:$0 sm:$0xff] }
  0x18   :  { %3336 = vmatmul.mubr.msk.f32.gmra.mrb[6].mxu0 %vm79_vm3, %v4227_v38 }
  0x19   :  { %3424 = vmatmul.mubr.msk.f32.gmra.mrb[6].mxu1 %vm79_vm3, %v4227_v38  ;;  %3338 = vmatprep.mubr.msk.f32.mxu0 %vm79_vm3, %v4234_v39 }
  0x1a   :  { %3426 = vmatprep.mubr.msk.f32.mxu1 %vm79_vm3, %v4234_v39 }
  0x1c   :  { %3339 = vmatmul.mubr.msk.f32.gmra.mrb[8].mxu0 %vm79_vm3, %v4245_v40 }
  0x1d   :  { %3427 = vmatmul.mubr.msk.f32.gmra.mrb[8].mxu1 %vm79_vm3, %v4245_v40  ;;  %3341 = vmatprep.mubr.msk.f32.mxu0 %vm79_vm3, %v4252_v41 }
  0x1e   :  { %3429 = vmatprep.mubr.msk.f32.mxu1 %vm79_vm3, %v4252_v41 }
  0x20   :  { %3342 = vmatmul.mubr.msk.f32.gmra.mrb[10].mxu0 %vm79_vm3, %v4263_v42 }
  0x21   :  { %3430 = vmatmul.mubr.msk.f32.gmra.mrb[10].mxu1 %vm79_vm3, %v4263_v42  ;;  %3344 = vmatprep.mubr.msk.f32.mxu0 %vm79_vm3, %v4270_v43 }
  0x22   :  { %3432 = vmatprep.mubr.msk.f32.mxu1 %vm79_vm3, %v4270_v43 }
  0x24   :  { %3345 = vmatmul.mubr.msk.f32.gmra.mrb[12].mxu0 %vm79_vm3, %v4281_v44 }
  0x25   :  { %3433 = vmatmul.mubr.msk.f32.gmra.mrb[12].mxu1 %vm79_vm3, %v4281_v44  ;;  %3347 = vmatprep.mubr.msk.f32.mxu0 %vm79_vm3, %v4288_v45 }
  0x26   :  { %3435 = vmatprep.mubr.msk.f32.mxu1 %vm79_vm3, %v4288_v45 }
  0x28   :  { %3348 = vmatmul.mubr.msk.f32.gmra.mrb[14].mxu0 %vm79_vm3, %v4299_v46 }
  0x29   :  { %3436 = vmatmul.mubr.msk.f32.gmra.mrb[14].mxu1 %vm79_vm3, %v4299_v46  ;;  %3350 = vmatprep.mubr.msk.f32.mxu0 %vm79_vm3, %v4306_v47 }
  0x2a   :  { %3438 = vmatprep.mubr.msk.f32.mxu1 %vm79_vm3, %v4306_v47 }
  0x2c   :  { %3351 = vmatmul.mubr.msk.f32.gmra.mrb[16].mxu0 %vm79_vm3, %v4317_v48 }
  0x2d   :  { %3439 = vmatmul.mubr.msk.f32.gmra.mrb[16].mxu1 %vm79_vm3, %v4317_v48  ;;  %3353 = vmatprep.mubr.msk.f32.mxu0 %vm79_vm3, %v4324_v49 }
  0x2e   :  { %3441 = vmatprep.mubr.msk.f32.mxu1 %vm79_vm3, %v4324_v49 }
  0x30   :  { %3354 = vmatmul.mubr.msk.f32.gmra.mrb[18].mxu0 %vm79_vm3, %v4335_v50 }
  0x31   :  { %3442 = vmatmul.mubr.msk.f32.gmra.mrb[18].mxu1 %vm79_vm3, %v4335_v50  ;;  %3356 = vmatprep.mubr.msk.f32.mxu0 %vm79_vm3, %v4342_v51 }
  0x32   :  { %3444 = vmatprep.mubr.msk.f32.mxu1 %vm79_vm3, %v4342_v51 }
  0x34   :  { %3357 = vmatmul.mubr.msk.f32.gmra.mrb[20].mxu0 %vm79_vm3, %v4353_v52 }
  0x35   :  { %3445 = vmatmul.mubr.msk.f32.gmra.mrb[20].mxu1 %vm79_vm3, %v4353_v52  ;;  %3359 = vmatprep.mubr.msk.f32.mxu0 %vm79_vm3, %v4360_v53 }
  0x36   :  { %3447 = vmatprep.mubr.msk.f32.mxu1 %vm79_vm3, %v4360_v53 }
  0x38   :  { %3360 = vmatmul.mubr.msk.f32.gmra.mrb[22].mxu0 %vm79_vm3, %v4371_v54 }
  0x39   :  { %3448 = vmatmul.mubr.msk.f32.gmra.mrb[22].mxu1 %vm79_vm3, %v4371_v54  ;;  %3370 = vmatprep.mubr.msk.f32.mxu0 %vm79_vm3, %v17_v55 }
  0x3a   :  { %3458 = vmatprep.mubr.msk.f32.mxu1 %vm79_vm3, %v17_v55 }
  0x3c   :  { %3371 = vmatmul.mubr.msk.f32.vlgmr.msra.gmra.mrb[0].mxu0 %vm79_vm3, %v4108_v13 }
  0x3d   :  { %3459 = vmatmul.mubr.msk.f32.vlgmr.msra.gmra.mrb[0].mxu1 %vm79_vm3, %v4108_v13  ;;  %3801 = vmatpush3.bf16.msra.mxu0 %v4189_v33  ;;  %v3008_v13 = vld [vmem:[%s4921_s2 + $0x80] sm:$0xff] }
  0x3e   :  { %3811 = vmatpush3.bf16.msra.mxu1 %v4203_v36  ;;  %3373 = vmatprep.mubr.msk.f32.mxu0 %vm79_vm3, %v4135_v20  ;;  %v3848_v16 = vpack.c.bf16 %v3009_v14, %v3008_v13 }
  0x3f   :  { %3461 = vmatprep.mubr.msk.f32.mxu1 %vm79_vm3, %v4135_v20  ;;  %3804 = vmatprep.subr.msk.bf16.mxu0 %vm4095_vm2, %v3802_v60 }
  0x40   :  { %3374 = vmatmul.mubr.msk.f32.gmra.mrb[2].mxu0 %vm79_vm3, %v4151_v24  ;;  %3814 = vmatprep.subr.msk.bf16.mxu1 %vm4095_vm2, %v3812_v61 }
  0x41   :  { %3462 = vmatmul.mubr.msk.f32.gmra.mrb[2].mxu1 %vm79_vm3, %v4151_v24  ;;  %3376 = vmatprep.mubr.msk.f32.mxu0 %vm79_vm3, %v4163_v28 }
  0x42   :  { %3464 = vmatprep.mubr.msk.f32.mxu1 %vm79_vm3, %v4163_v28  ;;  %3807 = vmatpush3.bf16.msk.msra.mxu0 %vm4095_vm2, %v3802_v60 }
  0x43   :  { %3817 = vmatpush3.bf16.msk.msra.mxu1 %vm4095_vm2, %v3812_v61  ;;  %3819 = vmatprep.subr.bf16.mxu0 %v3818_v2 }
  0x44   :  { %3377 = vmatmul.mubr.msk.f32.gmra.mrb[4].mxu0 %vm79_vm3, %v4170_v29  ;;  %3829 = vmatprep.subr.bf16.mxu1 %v3828_v3 }
  0x45   :  { %3465 = vmatmul.mubr.msk.f32.gmra.mrb[4].mxu1 %vm79_vm3, %v4170_v29  ;;  %3379 = vmatprep.mubr.msk.f32.mxu0 %vm79_vm3, %v4201_v35 }
  0x46   :  { %3467 = vmatprep.mubr.msk.f32.mxu1 %vm79_vm3, %v4201_v35 }
  0x48   :  { %3380 = vmatmul.mubr.msk.f32.gmra.mrb[6].mxu0 %vm79_vm3, %v4210_v37 }
  0x49   :  { %3468 = vmatmul.mubr.msk.f32.gmra.mrb[6].mxu1 %vm79_vm3, %v4210_v37  ;;  %3382 = vmatprep.mubr.msk.f32.mxu0 %vm79_vm3, %v4227_v38 }
  0x4a   :  { %3470 = vmatprep.mubr.msk.f32.mxu1 %vm79_vm3, %v4227_v38 }
  0x4c   :  { %3383 = vmatmul.mubr.msk.f32.gmra.mrb[8].mxu0 %vm79_vm3, %v4234_v39 }
  0x4d   :  { %3471 = vmatmul.mubr.msk.f32.gmra.mrb[8].mxu1 %vm79_vm3, %v4234_v39  ;;  %3385 = vmatprep.mubr.msk.f32.mxu0 %vm79_vm3, %v4245_v40 }
  0x4e   :  { %3473 = vmatprep.mubr.msk.f32.mxu1 %vm79_vm3, %v4245_v40 }
  0x50   :  { %3386 = vmatmul.mubr.msk.f32.gmra.mrb[10].mxu0 %vm79_vm3, %v4252_v41 }
  0x51   :  { %3474 = vmatmul.mubr.msk.f32.gmra.mrb[10].mxu1 %vm79_vm3, %v4252_v41  ;;  %3388 = vmatprep.mubr.msk.f32.mxu0 %vm79_vm3, %v4263_v42 }
  0x52   :  { %3476 = vmatprep.mubr.msk.f32.mxu1 %vm79_vm3, %v4263_v42 }
  0x54   :  { %3389 = vmatmul.mubr.msk.f32.gmra.mrb[12].mxu0 %vm79_vm3, %v4270_v43 }
  0x55   :  { %3477 = vmatmul.mubr.msk.f32.gmra.mrb[12].mxu1 %vm79_vm3, %v4270_v43  ;;  %3391 = vmatprep.mubr.msk.f32.mxu0 %vm79_vm3, %v4281_v44 }
  0x56   :  { %3479 = vmatprep.mubr.msk.f32.mxu1 %vm79_vm3, %v4281_v44 }
  0x58   :  { %3392 = vmatmul.mubr.msk.f32.gmra.mrb[14].mxu0 %vm79_vm3, %v4288_v45 }
  0x59   :  { %3480 = vmatmul.mubr.msk.f32.gmra.mrb[14].mxu1 %vm79_vm3, %v4288_v45  ;;  %3394 = vmatprep.mubr.msk.f32.mxu0 %vm79_vm3, %v4299_v46 }
  0x5a   :  { %3482 = vmatprep.mubr.msk.f32.mxu1 %vm79_vm3, %v4299_v46 }
  0x5c   :  { %3395 = vmatmul.mubr.msk.f32.gmra.mrb[16].mxu0 %vm79_vm3, %v4306_v47 }
  0x5d   :  { %3483 = vmatmul.mubr.msk.f32.gmra.mrb[16].mxu1 %vm79_vm3, %v4306_v47  ;;  %3397 = vmatprep.mubr.msk.f32.mxu0 %vm79_vm3, %v4317_v48 }
  0x5e   :  { %3485 = vmatprep.mubr.msk.f32.mxu1 %vm79_vm3, %v4317_v48 }
  0x60   :  { %3398 = vmatmul.mubr.msk.f32.gmra.mrb[18].mxu0 %vm79_vm3, %v4324_v49 }
  0x61   :  { %3486 = vmatmul.mubr.msk.f32.gmra.mrb[18].mxu1 %vm79_vm3, %v4324_v49  ;;  %3400 = vmatprep.mubr.msk.f32.mxu0 %vm79_vm3, %v4335_v50 }
  0x62   :  { %3488 = vmatprep.mubr.msk.f32.mxu1 %vm79_vm3, %v4335_v50 }
  0x64   :  { %3401 = vmatmul.mubr.msk.f32.gmra.mrb[20].mxu0 %vm79_vm3, %v4342_v51 }
  0x65   :  { %3489 = vmatmul.mubr.msk.f32.gmra.mrb[20].mxu1 %vm79_vm3, %v4342_v51  ;;  %3403 = vmatprep.mubr.msk.f32.mxu0 %vm79_vm3, %v4353_v52 }
  0x66   :  { %3491 = vmatprep.mubr.msk.f32.mxu1 %vm79_vm3, %v4353_v52 }
  0x68   :  { %3404 = vmatmul.mubr.msk.f32.gmra.mrb[22].mxu0 %vm79_vm3, %v4360_v53 }
  0x69   :  { %3492 = vmatmul.mubr.msk.f32.gmra.mrb[22].mxu1 %vm79_vm3, %v4360_v53  ;;  %3502 = vmatprep.mubr.msk.f32.mxu0 %vm79_vm3, %v4135_v20 }
  0x6a   :  { %3546 = vmatprep.mubr.msk.f32.mxu1 %vm79_vm3, %v4135_v20  ;;  %v3010_v20 = vld [vmem:[%s4921_s2 + $0x90] sm:$0xff] }
  0x6b   :  { %v3852_v23 = vpack.c.bf16 %v3011_v21, %v3010_v20 }
  0x6c   :  { %3503 = vmatmul.mubr.msk.f32.vlgmr.msra.gmra.mrb[0].mxu0 %vm79_vm3, %v4151_v24 }
  0x6d   :  { %3547 = vmatmul.mubr.msk.f32.vlgmr.msra.gmra.mrb[0].mxu1 %vm79_vm3, %v4151_v24  ;;  %3821 = vmatpush3.bf16.msra.mxu0 %v3818_v2 }
  0x6e   :  { %3831 = vmatpush3.bf16.msra.mxu1 %v3828_v3  ;;  %3505 = vmatprep.mubr.msk.f32.mxu0 %vm79_vm3, %v4163_v28 }
  0x6f   :  { %3549 = vmatprep.mubr.msk.f32.mxu1 %vm79_vm3, %v4163_v28  ;;  %3824 = vmatprep.subr.msk.bf16.mxu0 %vm4095_vm2, %v3822_v8 }
  0x70   :  { %3506 = vmatmul.mubr.msk.f32.gmra.mrb[2].mxu0 %vm79_vm3, %v4170_v29  ;;  %3834 = vmatprep.subr.msk.bf16.mxu1 %vm4095_vm2, %v3832_v10 }
  0x71   :  { %3550 = vmatmul.mubr.msk.f32.gmra.mrb[2].mxu1 %vm79_vm3, %v4170_v29  ;;  %3508 = vmatprep.mubr.msk.f32.mxu0 %vm79_vm3, %v4201_v35 }
  0x72   :  { %3552 = vmatprep.mubr.msk.f32.mxu1 %vm79_vm3, %v4201_v35  ;;  %3827 = vmatpush3.bf16.msk.msra.mxu0 %vm4095_vm2, %v3822_v8 }
  0x73   :  { %3837 = vmatpush3.bf16.msk.msra.mxu1 %vm4095_vm2, %v3832_v10  ;;  %3839 = vmatprep.subr.bf16.mxu0 %v3838_v15 }
  0x74   :  { %3509 = vmatmul.mubr.msk.f32.gmra.mrb[4].mxu0 %vm79_vm3, %v4210_v37  ;;  %3849 = vmatprep.subr.bf16.mxu1 %v3848_v16 }
  0x75   :  { %3553 = vmatmul.mubr.msk.f32.gmra.mrb[4].mxu1 %vm79_vm3, %v4210_v37  ;;  %3511 = vmatprep.mubr.msk.f32.mxu0 %vm79_vm3, %v4227_v38 }
  0x76   :  { %3555 = vmatprep.mubr.msk.f32.mxu1 %vm79_vm3, %v4227_v38 }
  0x78   :  { %3512 = vmatmul.mubr.msk.f32.gmra.mrb[6].mxu0 %vm79_vm3, %v4234_v39 }
  0x79   :  { %3556 = vmatmul.mubr.msk.f32.gmra.mrb[6].mxu1 %vm79_vm3, %v4234_v39  ;;  %3514 = vmatprep.mubr.msk.f32.mxu0 %vm79_vm3, %v4245_v40 }
  0x7a   :  { %3558 = vmatprep.mubr.msk.f32.mxu1 %vm79_vm3, %v4245_v40 }
  0x7c   :  { %3515 = vmatmul.mubr.msk.f32.gmra.mrb[8].mxu0 %vm79_vm3, %v4252_v41 }
  0x7d   :  { %3559 = vmatmul.mubr.msk.f32.gmra.mrb[8].mxu1 %vm79_vm3, %v4252_v41  ;;  %3517 = vmatprep.mubr.msk.f32.mxu0 %vm79_vm3, %v4263_v42 }
  0x7e   :  { %3561 = vmatprep.mubr.msk.f32.mxu1 %vm79_vm3, %v4263_v42 }
  0x80   :  { %3518 = vmatmul.mubr.msk.f32.gmra.mrb[10].mxu0 %vm79_vm3, %v4270_v43 }
  0x81   :  { %3562 = vmatmul.mubr.msk.f32.gmra.mrb[10].mxu1 %vm79_vm3, %v4270_v43  ;;  %3520 = vmatprep.mubr.msk.f32.mxu0 %vm79_vm3, %v4281_v44 }
  0x82   :  { %3564 = vmatprep.mubr.msk.f32.mxu1 %vm79_vm3, %v4281_v44 }
  0x84   :  { %3521 = vmatmul.mubr.msk.f32.gmra.mrb[12].mxu0 %vm79_vm3, %v4288_v45 }
  0x85   :  { %3565 = vmatmul.mubr.msk.f32.gmra.mrb[12].mxu1 %vm79_vm3, %v4288_v45  ;;  %3523 = vmatprep.mubr.msk.f32.mxu0 %vm79_vm3, %v4299_v46 }
  0x86   :  { %3567 = vmatprep.mubr.msk.f32.mxu1 %vm79_vm3, %v4299_v46 }
  0x88   :  { %3524 = vmatmul.mubr.msk.f32.gmra.mrb[14].mxu0 %vm79_vm3, %v4306_v47 }
  0x89   :  { %3568 = vmatmul.mubr.msk.f32.gmra.mrb[14].mxu1 %vm79_vm3, %v4306_v47  ;;  %3526 = vmatprep.mubr.msk.f32.mxu0 %vm79_vm3, %v4317_v48 }
  0x8a   :  { %3570 = vmatprep.mubr.msk.f32.mxu1 %vm79_vm3, %v4317_v48 }
  0x8c   :  { %3527 = vmatmul.mubr.msk.f32.gmra.mrb[16].mxu0 %vm79_vm3, %v4324_v49 }
  0x8d   :  { %3571 = vmatmul.mubr.msk.f32.gmra.mrb[16].mxu1 %vm79_vm3, %v4324_v49  ;;  %3529 = vmatprep.mubr.msk.f32.mxu0 %vm79_vm3, %v4335_v50 }
  0x8e   :  { %3573 = vmatprep.mubr.msk.f32.mxu1 %vm79_vm3, %v4335_v50 }
  0x90   :  { %3530 = vmatmul.mubr.msk.f32.gmra.mrb[18].mxu0 %vm79_vm3, %v4342_v51 }
  0x91   :  { %3574 = vmatmul.mubr.msk.f32.gmra.mrb[18].mxu1 %vm79_vm3, %v4342_v51  ;;  %3532 = vmatprep.mubr.msk.f32.mxu0 %vm79_vm3, %v4353_v52 }
  0x92   :  { %3576 = vmatprep.mubr.msk.f32.mxu1 %vm79_vm3, %v4353_v52 }
  0x94   :  { %3533 = vmatmul.mubr.msk.f32.gmra.mrb[20].mxu0 %vm79_vm3, %v4360_v53 }
  0x95   :  { %3577 = vmatmul.mubr.msk.f32.gmra.mrb[20].mxu1 %vm79_vm3, %v4360_v53  ;;  %3535 = vmatprep.mubr.msk.f32.mxu0 %vm79_vm3, %v4371_v54 }
  0x96   :  { %3579 = vmatprep.mubr.msk.f32.mxu1 %vm79_vm3, %v4371_v54 }
  0x98   :  { %3536 = vmatmul.mubr.msk.f32.gmra.mrb[22].mxu0 %vm79_vm3, %v4635_v17 }
  0x99   :  { %3580 = vmatmul.mubr.msk.f32.gmra.mrb[22].mxu1 %vm79_vm3, %v4635_v17  ;;  %3590 = vmatprep.mubr.msk.f32.mxu0 %vm79_vm3, %v4151_v24 }
  0x9a   :  { %3634 = vmatprep.mubr.msk.f32.mxu1 %vm79_vm3, %v4151_v24  ;;  %v2978_v24 = vld [vmem:[%s4922_s0 + $0xd8] sm:$0xff] }
  0x9c   :  { %3591 = vmatmul.mubr.msk.f32.vlgmr.msra.gmra.mrb[0].mxu0 %vm79_vm3, %v4163_v28 }
  0x9d   :  { %3635 = vmatmul.mubr.msk.f32.vlgmr.msra.gmra.mrb[0].mxu1 %vm79_vm3, %v4163_v28  ;;  %3841 = vmatpush3.bf16.msra.mxu0 %v3838_v15 }
  0x9e   :  { %3851 = vmatpush3.bf16.msra.mxu1 %v3848_v16  ;;  %3593 = vmatprep.mubr.msk.f32.mxu0 %vm79_vm3, %v4170_v29 }
  0x9f   :  { %3637 = vmatprep.mubr.msk.f32.mxu1 %vm79_vm3, %v4170_v29  ;;  %3844 = vmatprep.subr.msk.bf16.mxu0 %vm4095_vm2, %v3842_v22 }
  0xa0   :  { %3594 = vmatmul.mubr.msk.f32.gmra.mrb[2].mxu0 %vm79_vm3, %v4201_v35  ;;  %3854 = vmatprep.subr.msk.bf16.mxu1 %vm4095_vm2, %v3852_v23 }
  0xa1   :  { %3638 = vmatmul.mubr.msk.f32.gmra.mrb[2].mxu1 %vm79_vm3, %v4201_v35  ;;  %3596 = vmatprep.mubr.msk.f32.mxu0 %vm79_vm3, %v4210_v37 }
  0xa2   :  { %3640 = vmatprep.mubr.msk.f32.mxu1 %vm79_vm3, %v4210_v37  ;;  %3847 = vmatpush3.bf16.msk.msra.mxu0 %vm4095_vm2, %v3842_v22 }
  0xa3   :  { %3857 = vmatpush3.bf16.msk.msra.mxu1 %vm4095_vm2, %v3852_v23 }
  0xa4   :  { %3597 = vmatmul.mubr.msk.f32.gmra.mrb[4].mxu0 %vm79_vm3, %v4227_v38 }
  0xa5   :  { %3641 = vmatmul.mubr.msk.f32.gmra.mrb[4].mxu1 %vm79_vm3, %v4227_v38  ;;  %3599 = vmatprep.mubr.msk.f32.mxu0 %vm79_vm3, %v4234_v39 }
  0xa6   :  { %3643 = vmatprep.mubr.msk.f32.mxu1 %vm79_vm3, %v4234_v39 }
  0xa8   :  { %3600 = vmatmul.mubr.msk.f32.gmra.mrb[6].mxu0 %vm79_vm3, %v4245_v40 }
  0xa9   :  { %3644 = vmatmul.mubr.msk.f32.gmra.mrb[6].mxu1 %vm79_vm3, %v4245_v40  ;;  %3602 = vmatprep.mubr.msk.f32.mxu0 %vm79_vm3, %v4252_v41 }
  0xaa   :  { %3646 = vmatprep.mubr.msk.f32.mxu1 %vm79_vm3, %v4252_v41 }
  0xac   :  { %3603 = vmatmul.mubr.msk.f32.gmra.mrb[8].mxu0 %vm79_vm3, %v4263_v42 }
  0xad   :  { %3647 = vmatmul.mubr.msk.f32.gmra.mrb[8].mxu1 %vm79_vm3, %v4263_v42  ;;  %3605 = vmatprep.mubr.msk.f32.mxu0 %vm79_vm3, %v4270_v43 }
  0xae   :  { %3649 = vmatprep.mubr.msk.f32.mxu1 %vm79_vm3, %v4270_v43 }
  0xb0   :  { %3606 = vmatmul.mubr.msk.f32.gmra.mrb[10].mxu0 %vm79_vm3, %v4281_v44 }
  0xb1   :  { %3650 = vmatmul.mubr.msk.f32.gmra.mrb[10].mxu1 %vm79_vm3, %v4281_v44  ;;  %3608 = vmatprep.mubr.msk.f32.mxu0 %vm79_vm3, %v4288_v45 }
  0xb2   :  { %3652 = vmatprep.mubr.msk.f32.mxu1 %vm79_vm3, %v4288_v45 }
  0xb4   :  { %3609 = vmatmul.mubr.msk.f32.gmra.mrb[12].mxu0 %vm79_vm3, %v4299_v46 }
  0xb5   :  { %3653 = vmatmul.mubr.msk.f32.gmra.mrb[12].mxu1 %vm79_vm3, %v4299_v46  ;;  %3611 = vmatprep.mubr.msk.f32.mxu0 %vm79_vm3, %v4306_v47 }
  0xb6   :  { %3655 = vmatprep.mubr.msk.f32.mxu1 %vm79_vm3, %v4306_v47 }
  0xb8   :  { %3612 = vmatmul.mubr.msk.f32.gmra.mrb[14].mxu0 %vm79_vm3, %v4317_v48 }
  0xb9   :  { %3656 = vmatmul.mubr.msk.f32.gmra.mrb[14].mxu1 %vm79_vm3, %v4317_v48  ;;  %3614 = vmatprep.mubr.msk.f32.mxu0 %vm79_vm3, %v4324_v49 }
  0xba   :  { %3658 = vmatprep.mubr.msk.f32.mxu1 %vm79_vm3, %v4324_v49 }
  0xbc   :  { %3615 = vmatmul.mubr.msk.f32.gmra.mrb[16].mxu0 %vm79_vm3, %v4335_v50 }
  0xbd   :  { %3659 = vmatmul.mubr.msk.f32.gmra.mrb[16].mxu1 %vm79_vm3, %v4335_v50  ;;  %3617 = vmatprep.mubr.msk.f32.mxu0 %vm79_vm3, %v4342_v51 }
  0xbe   :  { %3661 = vmatprep.mubr.msk.f32.mxu1 %vm79_vm3, %v4342_v51 }
  0xc0   :  { %3618 = vmatmul.mubr.msk.f32.gmra.mrb[18].mxu0 %vm79_vm3, %v4353_v52 }
  0xc1   :  { %3662 = vmatmul.mubr.msk.f32.gmra.mrb[18].mxu1 %vm79_vm3, %v4353_v52  ;;  %3620 = vmatprep.mubr.msk.f32.mxu0 %vm79_vm3, %v4360_v53 }
  0xc2   :  { %3664 = vmatprep.mubr.msk.f32.mxu1 %vm79_vm3, %v4360_v53 }
  0xc4   :  { %3621 = vmatmul.mubr.msk.f32.gmra.mrb[20].mxu0 %vm79_vm3, %v4371_v54 }
  0xc5   :  { %3665 = vmatmul.mubr.msk.f32.gmra.mrb[20].mxu1 %vm79_vm3, %v4371_v54  ;;  %3623 = vmatprep.mubr.msk.f32.mxu0 %vm79_vm3, %v4635_v17 }
  0xc6   :  { %3667 = vmatprep.mubr.msk.f32.mxu1 %vm79_vm3, %v4635_v17 }
  0xc8   :  { %3624 = vmatmul.mubr.msk.f32.gmra.mrb[22].mxu0 %vm79_vm3, %v2896_v9 }
  0xc9   :  { %3668 = vmatmul.mubr.msk.f32.gmra.mrb[22].mxu1 %vm79_vm3, %v2896_v9  ;;  %3678 = vmatprep.mubr.msk.f32.mxu0 %vm79_vm3, %v4163_v28 }
  0xca   :  { %3722 = vmatprep.mubr.msk.f32.mxu1 %vm79_vm3, %v4163_v28 }
  0xcc   :  { %3679 = vmatmul.mubr.msk.f32.vlgmr.msra.gmra.mrb[0].mxu0 %vm79_vm3, %v4170_v29 }
  0xcd   :  { %3723 = vmatmul.mubr.msk.f32.vlgmr.msra.gmra.mrb[0].mxu1 %vm79_vm3, %v4170_v29  ;;  %3681 = vmatprep.mubr.msk.f32.mxu0 %vm79_vm3, %v4201_v35 }
  0xce   :  { %3725 = vmatprep.mubr.msk.f32.mxu1 %vm79_vm3, %v4201_v35 }
  0xd0   :  { %3682 = vmatmul.mubr.msk.f32.gmra.mrb[2].mxu0 %vm79_vm3, %v4210_v37 }
  0xd1   :  { %3726 = vmatmul.mubr.msk.f32.gmra.mrb[2].mxu1 %vm79_vm3, %v4210_v37  ;;  %3684 = vmatprep.mubr.msk.f32.mxu0 %vm79_vm3, %v4227_v38 }
  0xd2   :  { %3728 = vmatprep.mubr.msk.f32.mxu1 %vm79_vm3, %v4227_v38 }
  0xd4   :  { %3685 = vmatmul.mubr.msk.f32.gmra.mrb[4].mxu0 %vm79_vm3, %v4234_v39 }
  0xd5   :  { %3729 = vmatmul.mubr.msk.f32.gmra.mrb[4].mxu1 %vm79_vm3, %v4234_v39  ;;  %3687 = vmatprep.mubr.msk.f32.mxu0 %vm79_vm3, %v4245_v40 }
  0xd6   :  { %3731 = vmatprep.mubr.msk.f32.mxu1 %vm79_vm3, %v4245_v40 }
  0xd8   :  { %3688 = vmatmul.mubr.msk.f32.gmra.mrb[6].mxu0 %vm79_vm3, %v4252_v41 }
  0xd9   :  { %3732 = vmatmul.mubr.msk.f32.gmra.mrb[6].mxu1 %vm79_vm3, %v4252_v41  ;;  %3690 = vmatprep.mubr.msk.f32.mxu0 %vm79_vm3, %v4263_v42 }
  0xda   :  { %3734 = vmatprep.mubr.msk.f32.mxu1 %vm79_vm3, %v4263_v42 }
  0xdc   :  { %3691 = vmatmul.mubr.msk.f32.gmra.mrb[8].mxu0 %vm79_vm3, %v4270_v43 }
  0xdd   :  { %3735 = vmatmul.mubr.msk.f32.gmra.mrb[8].mxu1 %vm79_vm3, %v4270_v43  ;;  %3693 = vmatprep.mubr.msk.f32.mxu0 %vm79_vm3, %v4281_v44 }
  0xde   :  { %3737 = vmatprep.mubr.msk.f32.mxu1 %vm79_vm3, %v4281_v44 }
  0xe0   :  { %3694 = vmatmul.mubr.msk.f32.gmra.mrb[10].mxu0 %vm79_vm3, %v4288_v45 }
  0xe1   :  { %3738 = vmatmul.mubr.msk.f32.gmra.mrb[10].mxu1 %vm79_vm3, %v4288_v45  ;;  %3696 = vmatprep.mubr.msk.f32.mxu0 %vm79_vm3, %v4299_v46 }
  0xe2   :  { %3740 = vmatprep.mubr.msk.f32.mxu1 %vm79_vm3, %v4299_v46 }
  0xe4   :  { %3697 = vmatmul.mubr.msk.f32.gmra.mrb[12].mxu0 %vm79_vm3, %v4306_v47 }
  0xe5   :  { %3741 = vmatmul.mubr.msk.f32.gmra.mrb[12].mxu1 %vm79_vm3, %v4306_v47  ;;  %3699 = vmatprep.mubr.msk.f32.mxu0 %vm79_vm3, %v4317_v48 }
  0xe6   :  { %3743 = vmatprep.mubr.msk.f32.mxu1 %vm79_vm3, %v4317_v48 }
  0xe8   :  { %3700 = vmatmul.mubr.msk.f32.gmra.mrb[14].mxu0 %vm79_vm3, %v4324_v49 }
  0xe9   :  { %3744 = vmatmul.mubr.msk.f32.gmra.mrb[14].mxu1 %vm79_vm3, %v4324_v49  ;;  %3702 = vmatprep.mubr.msk.f32.mxu0 %vm79_vm3, %v4335_v50 }
  0xea   :  { %3746 = vmatprep.mubr.msk.f32.mxu1 %vm79_vm3, %v4335_v50 }
  0xec   :  { %3703 = vmatmul.mubr.msk.f32.gmra.mrb[16].mxu0 %vm79_vm3, %v4342_v51 }
  0xed   :  { %3747 = vmatmul.mubr.msk.f32.gmra.mrb[16].mxu1 %vm79_vm3, %v4342_v51  ;;  %3705 = vmatprep.mubr.msk.f32.mxu0 %vm79_vm3, %v4353_v52 }
  0xee   :  { %3749 = vmatprep.mubr.msk.f32.mxu1 %vm79_vm3, %v4353_v52 }
  0xf0   :  { %3706 = vmatmul.mubr.msk.f32.gmra.mrb[18].mxu0 %vm79_vm3, %v4360_v53 }
  0xf1   :  { %3750 = vmatmul.mubr.msk.f32.gmra.mrb[18].mxu1 %vm79_vm3, %v4360_v53  ;;  %3708 = vmatprep.mubr.msk.f32.mxu0 %vm79_vm3, %v4371_v54 }
  0xf2   :  { %3752 = vmatprep.mubr.msk.f32.mxu1 %vm79_vm3, %v4371_v54 }
  0xf4   :  { %3709 = vmatmul.mubr.msk.f32.gmra.mrb[20].mxu0 %vm79_vm3, %v4635_v17 }
  0xf5   :  { %3753 = vmatmul.mubr.msk.f32.gmra.mrb[20].mxu1 %vm79_vm3, %v4635_v17  ;;  %3711 = vmatprep.mubr.msk.f32.mxu0 %vm79_vm3, %v2896_v9 }
  0xf6   :  { %3755 = vmatprep.mubr.msk.f32.mxu1 %vm79_vm3, %v2896_v9 }
  0xf8   :  { %3712 = vmatmul.mubr.msk.f32.gmra.mrb[22].mxu0 %vm79_vm3, %v2978_v24 }
  0xf9   :  { %3756 = vmatmul.mubr.msk.f32.gmra.mrb[22].mxu1 %vm79_vm3, %v2978_v24 }
 0x19f   :  { %v3680_v25 = vpop.f32.mrb[0].mxu0 }
 0x1a0   :  { %v3724_v26 = vpop.f32.mrb[0].mxu1  ;;  %v2215_v27 = vpop.f32.mrb[1].mxu0 }
 0x1a1   :  { %v2576_v28 = vmax.f32 %v3680_v25, %v3724_v26  ;;  %v2432_v29 = vpop.f32.mrb[1].mxu1 }
 0x1a2   :  { %v2575_v30 = vmax.f32 %v2215_v27, %v2432_v29 }
 0x1a3   :  { %v3683_v32 = vpop.f32.mrb[2].mxu0 }
 0x1a4   :  { %v2599_v33 = vmax.f32 %v2575_v30, %v2576_v28  ;;  %v3727_v34 = vpop.f32.mrb[2].mxu1  ;;  %v2225_v35 = vpop.f32.mrb[3].mxu0 }
 0x1a5   :  { %v2578_v36 = vmax.f32 %v3683_v32, %v3727_v34  ;;  %v2442_v37 = vpop.f32.mrb[3].mxu1 }
 0x1a6   :  { %v2618_v38 = vadd.f32 %v4858_v31, %v2599_v33  ;;  %v2577_v39 = vmax.f32 %v2225_v35, %v2442_v37 }
 0x1a7   :  { %v3686_v40 = vpop.f32.mrb[4].mxu0 }
 0x1a8   :  { %v2630_v41 = vmax.f32 %v2618_v38, 0.0  ;;  %v2600_v42 = vmax.f32 %v2577_v39, %v2578_v36  ;;  %v3730_v43 = vpop.f32.mrb[4].mxu1  ;;  %v2235_v44 = vpop.f32.mrb[5].mxu0 }
 0x1a9   :  { %v2580_v45 = vmax.f32 %v3686_v40, %v3730_v43  ;;  %v2452_v46 = vpop.f32.mrb[5].mxu1 }
 0x1aa   :  { %2643 = vst.msk [vmem:[%s4924_s4] sm:$0xff] %vm2642_vm4, %v2630_v41  ;;  %v2619_v47 = vadd.f32 %v4858_v31, %v2600_v42  ;;  %v2579_v48 = vmax.f32 %v2235_v44, %v2452_v46 }
 0x1ab   :  { %v3689_v49 = vpop.f32.mrb[6].mxu0 }
 0x1ac   :  { %v2631_v50 = vmax.f32 %v2619_v47, 0.0  ;;  %v2601_v51 = vmax.f32 %v2579_v48, %v2580_v45  ;;  %v3733_v52 = vpop.f32.mrb[6].mxu1  ;;  %v2245_v53 = vpop.f32.mrb[7].mxu0 }
 0x1ad   :  { %v2582_v54 = vmax.f32 %v3689_v49, %v3733_v52  ;;  %v2462_v55 = vpop.f32.mrb[7].mxu1 }
 0x1ae   :  { %2644 = vst.msk [vmem:[%s4924_s4 + $0x8] sm:$0xff] %vm2642_vm4, %v2631_v50  ;;  %v2620_v56 = vadd.f32 %v4858_v31, %v2601_v51  ;;  %v2581_v57 = vmax.f32 %v2245_v53, %v2462_v55 }
 0x1af   :  { %v3692_v58 = vpop.f32.mrb[8].mxu0 }
 0x1b0   :  { %v2632_v59 = vmax.f32 %v2620_v56, 0.0  ;;  %v2602_v60 = vmax.f32 %v2581_v57, %v2582_v54  ;;  %v3736_v61 = vpop.f32.mrb[8].mxu1  ;;  %v2255_v62 = vpop.f32.mrb[9].mxu0 }
 0x1b1   :  { %v2584_v63 = vmax.f32 %v3692_v58, %v3736_v61  ;;  %v2472_v0 = vpop.f32.mrb[9].mxu1 }
 0x1b2   :  { %2645 = vst.msk [vmem:[%s4924_s4 + $0x10] sm:$0xff] %vm2642_vm4, %v2632_v59  ;;  %v2621_v1 = vadd.f32 %v4858_v31, %v2602_v60  ;;  %v2583_v2 = vmax.f32 %v2255_v62, %v2472_v0 }
 0x1b3   :  { %v3695_v3 = vpop.f32.mrb[10].mxu0 }
 0x1b4   :  { %v2633_v4 = vmax.f32 %v2621_v1, 0.0  ;;  %v2603_v5 = vmax.f32 %v2583_v2, %v2584_v63  ;;  %v3739_v6 = vpop.f32.mrb[10].mxu1  ;;  %v2265_v7 = vpop.f32.mrb[11].mxu0 }
 0x1b5   :  { %v2586_v8 = vmax.f32 %v3695_v3, %v3739_v6  ;;  %v2482_v10 = vpop.f32.mrb[11].mxu1 }
 0x1b6   :  { %2646 = vst.msk [vmem:[%s4924_s4 + $0x18] sm:$0xff] %vm2642_vm4, %v2633_v4  ;;  %v2622_v11 = vadd.f32 %v4858_v31, %v2603_v5  ;;  %v2585_v12 = vmax.f32 %v2265_v7, %v2482_v10 }
 0x1b7   :  { %v3698_v13 = vpop.f32.mrb[12].mxu0 }
 0x1b8   :  { %v2634_v14 = vmax.f32 %v2622_v11, 0.0  ;;  %v2604_v15 = vmax.f32 %v2585_v12, %v2586_v8  ;;  %v3742_v16 = vpop.f32.mrb[12].mxu1  ;;  %v2275_v17 = vpop.f32.mrb[13].mxu0 }
 0x1b9   :  { %v2588_v18 = vmax.f32 %v3698_v13, %v3742_v16  ;;  %v2492_v19 = vpop.f32.mrb[13].mxu1 }
 0x1ba   :  { %2647 = vst.msk [vmem:[%s4924_s4 + $0x20] sm:$0xff] %vm2642_vm4, %v2634_v14  ;;  %v2623_v20 = vadd.f32 %v4858_v31, %v2604_v15  ;;  %v2587_v21 = vmax.f32 %v2275_v17, %v2492_v19 }
 0x1bb   :  { %v3701_v22 = vpop.f32.mrb[14].mxu0 }
 0x1bc   :  { %v2635_v23 = vmax.f32 %v2623_v20, 0.0  ;;  %v2605_v9 = vmax.f32 %v2587_v21, %v2588_v18  ;;  %v3745_v24 = vpop.f32.mrb[14].mxu1  ;;  %v2285_v25 = vpop.f32.mrb[15].mxu0 }
 0x1bd   :  { %v2590_v26 = vmax.f32 %v3701_v22, %v3745_v24  ;;  %v2502_v27 = vpop.f32.mrb[15].mxu1 }
 0x1be   :  { %2648 = vst.msk [vmem:[%s4924_s4 + $0x28] sm:$0xff] %vm2642_vm4, %v2635_v23  ;;  %v2624_v28 = vadd.f32 %v4858_v31, %v2605_v9  ;;  %v2589_v29 = vmax.f32 %v2285_v25, %v2502_v27 }
 0x1bf   :  { %v3704_v30 = vpop.f32.mrb[16].mxu0 }
 0x1c0   :  { %v2636_v32 = vmax.f32 %v2624_v28, 0.0  ;;  %v2606_v33 = vmax.f32 %v2589_v29, %v2590_v26  ;;  %v3748_v34 = vpop.f32.mrb[16].mxu1  ;;  %v2295_v35 = vpop.f32.mrb[17].mxu0 }
 0x1c1   :  { %v2592_v36 = vmax.f32 %v3704_v30, %v3748_v34  ;;  %v2512_v37 = vpop.f32.mrb[17].mxu1 }
 0x1c2   :  { %2649 = vst.msk [vmem:[%s4924_s4 + $0x30] sm:$0xff] %vm2642_vm4, %v2636_v32  ;;  %v2625_v38 = vadd.f32 %v4858_v31, %v2606_v33  ;;  %v2591_v39 = vmax.f32 %v2295_v35, %v2512_v37 }
 0x1c3   :  { %v3707_v40 = vpop.f32.mrb[18].mxu0 }
 0x1c4   :  { %v2637_v41 = vmax.f32 %v2625_v38, 0.0  ;;  %v2607_v42 = vmax.f32 %v2591_v39, %v2592_v36  ;;  %v3751_v43 = vpop.f32.mrb[18].mxu1  ;;  %v2305_v44 = vpop.f32.mrb[19].mxu0 }
 0x1c5   :  { %v2594_v45 = vmax.f32 %v3707_v40, %v3751_v43  ;;  %v2522_v46 = vpop.f32.mrb[19].mxu1 }
 0x1c6   :  { %2650 = vst.msk [vmem:[%s4924_s4 + $0x38] sm:$0xff] %vm2642_vm4, %v2637_v41  ;;  %v2626_v47 = vadd.f32 %v4858_v31, %v2607_v42  ;;  %v2593_v48 = vmax.f32 %v2305_v44, %v2522_v46 }
 0x1c7   :  { %v3710_v49 = vpop.f32.mrb[20].mxu0 }
 0x1c8   :  { %v2638_v50 = vmax.f32 %v2626_v47, 0.0  ;;  %v2608_v51 = vmax.f32 %v2593_v48, %v2594_v45  ;;  %v3754_v52 = vpop.f32.mrb[20].mxu1  ;;  %v2315_v53 = vpop.f32.mrb[21].mxu0 }
 0x1c9   :  { %v2596_v54 = vmax.f32 %v3710_v49, %v3754_v52  ;;  %v2532_v55 = vpop.f32.mrb[21].mxu1 }
 0x1ca   :  { %2651 = vst.msk [vmem:[%s4924_s4 + $0x40] sm:$0xff] %vm2642_vm4, %v2638_v50  ;;  %v2627_v56 = vadd.f32 %v4858_v31, %v2608_v51  ;;  %v2595_v57 = vmax.f32 %v2315_v53, %v2532_v55 }
 0x1cb   :  { %v3713_v58 = vpop.f32.mrb[22].mxu0 }
 0x1cc   :  { %v2639_v59 = vmax.f32 %v2627_v56, 0.0  ;;  %v2609_v60 = vmax.f32 %v2595_v57, %v2596_v54  ;;  %v3757_v61 = vpop.f32.mrb[22].mxu1  ;;  %v2325_v62 = vpop.f32.mrb[23].mxu0 }
 0x1cd   :  { %v2598_v63 = vmax.f32 %v3713_v58, %v3757_v61  ;;  %v2542_v0 = vpop.f32.mrb[23].mxu1 }
 0x1ce   :  { %2652 = vst.msk [vmem:[%s4924_s4 + $0x48] sm:$0xff] %vm2642_vm4, %v2639_v59  ;;  %v2628_v1 = vadd.f32 %v4858_v31, %v2609_v60  ;;  %v2597_v2 = vmax.f32 %v2325_v62, %v2542_v0 }
 0x1d0   :  { %v2640_v3 = vmax.f32 %v2628_v1, 0.0  ;;  %v2610_v4 = vmax.f32 %v2597_v2, %v2598_v63 }
 0x1d2   :  { %2653 = vst.msk [vmem:[%s4924_s4 + $0x50] sm:$0xff] %vm2642_vm4, %v2640_v3  ;;  %v2629_v5 = vadd.f32 %v4858_v31, %v2610_v4 }
 0x1d4   :  { %v2641_v6 = vmax.f32 %v2629_v5, 0.0 }
 0x1d6   :  { %2654 = vst.msk [vmem:[%s4924_s4 + $0x58] sm:$0xff] %vm2642_vm4, %v2641_v6 }

// kernel: tile.18
= control target key start
LH: loop header
LB: loop body
LE: loop exit
PB: predicated region body
PF: predicated region fallthrough
CT: control target
= control target key end

     0   :  { %s22_s0 = inlined_call_operand.vmem [shape: f32[20], index: 0, kind: input, shape index: {}]   ;;  %s23_s1 = inlined_call_operand.vmem [shape: f32[4,20], index: 1, kind: output, shape index: {}]  }
   0x1   :  { %v4_v0 = vld [vmem:[%s22_s0] ss:$0 sm:$0xff] }
   0x2   :  { %5 = vst [vmem:[%s23_s1] sm:$0xf] %v4_v0 }

// kernel: tile.19
= control target key start
LH: loop header
LB: loop body
LE: loop exit
PB: predicated region body
PF: predicated region fallthrough
CT: control target
= control target key end

     0   :  { %vm7_vm0 = vcmask 162816   ;;  %s37_s8 = smov 20   ;;  %s38_s9 = smov 40   ;;  %vm13_vm1 = vcmask 654816   ;;  %vm19_vm2 = vcmask 490816   ;;  %vm25_vm3 = vcmask 326816   ;;  %s55_s0 = inlined_call_operand.vmem [shape: f32[4,20], index: 0, kind: input, shape index: {}]   ;;  %s56_s1 = inlined_call_operand.vmem [shape: f32[1,80], index: 1, kind: output, shape index: {}]  }
   0x1   :  { %v4_v0 = vld [vmem:[%s55_s0] sm:$0xf]  ;;  %s36_s0 = smov 60  }
   0x2   :  { %5 = vst [vmem:[#allocation1] sm:$0xf] %v4_v0 }
   0x9   :  { %v10_v1 = vld [vmem:[#allocation1 + $0x3] sm:$0x1]   ;;  %v22_v2 = vld [vmem:[#allocation1 + $0x1] sm:$0x1]   ;;  %v6_v3 = vld [vmem:[#allocation1] sm:$0x1]  }
   0xa   :  { %11 = vrot.lane.b32.xlu0 %v10_v1, %s36_s0  ;;  %23 = vrot.lane.b32.xlu1 %v22_v2, %s37_s8  ;;  %v16_v4 = vld [vmem:[#allocation1 + $0x2] sm:$0x1]   ;;  %8 = vst.msk [vmem:[#allocation0] sm:$0x1] %vm7_vm0, %v6_v3  }
   0xe   :  { %17 = vrot.lane.b32.xlu0 %v16_v4, %s38_s9 }
  0x7c   :  { %v12_v5 = vpop.permute.xlu0 %11   ;;  %v24_v6 = vpop.permute.xlu1 %23  }
  0x7d   :  { %14 = vst.msk [vmem:[#allocation0] sm:$0x1] %vm13_vm1, %v12_v5  }
  0x80   :  { %v18_v7 = vpop.permute.xlu0 %17  }
  0x81   :  { %20 = vst.msk [vmem:[#allocation0] sm:$0x1] %vm19_vm2, %v18_v7  }
  0x82   :  { %26 = vst.msk [vmem:[#allocation0] sm:$0x1] %vm25_vm3, %v24_v6  }
  0x89   :  { %v30_v8 = vld [vmem:[#allocation0] sm:$0x1] }
  0x8a   :  { %32 = vst [vmem:[%s56_s1] sm:$0x1] %v30_v8 }

// kernel: convnet_forward.3
= control target key start
LH: loop header
LB: loop body
LE: loop exit
PB: predicated region body
PF: predicated region fallthrough
CT: control target
= control target key end

     0   :  { %vm92_vm0 = vcmask 982016   ;;  %vm3437_vm1 = vmmov 0   ;;  %vm1498_vm2 = vcmask 654336   ;;  %vm1842_vm3 = vcmask 1041408   ;;  %s4346_s1 = inlined_call_operand.vmem [shape: f32[5,120,80], index: 1, kind: input, shape index: {}]   ;;  %s4347_s2 = inlined_call_operand.vmem [shape: f32[5,120,80], index: 2, kind: input, shape index: {}]   ;;  %s4348_s0 = inlined_call_operand.vmem [shape: f32[12,8,120], index: 0, kind: input, shape index: {}]   ;;  %s4349_s4 = inlined_call_operand.vmem [shape: f32[4,80,50], index: 4, kind: input, shape index: {}]   ;;  %s4350_s3 = inlined_call_operand.vmem [shape: f32[1,80], index: 3, kind: input, shape index: {}]   ;;  %s4351_s6 = inlined_call_operand.vmem [shape: f32[50,10], index: 6, kind: input, shape index: {}]   ;;  %s4352_s5 = inlined_call_operand.vmem [shape: f32[1,50], index: 5, kind: input, shape index: {}]   ;;  %s4353_s7 = inlined_call_operand.vmem [shape: f32[1,10], index: 7, kind: input, shape index: {}]   ;;  %s4354_s8 = inlined_call_operand.vmem [shape: f32[8,10], index: 8, kind: output, shape index: {}]  }
   0x1   :  { %v1942_v0 = vld [vmem:[%s4346_s1 + $0x78] sm:$0xff]  ;;  %v1943_v1 = vld [vmem:[%s4346_s1 + $0x80] sm:$0xff]  ;;  %v1944_v5 = vld [vmem:[%s4346_s1 + $0x88] sm:$0xff]  ;;  %vm1838_vm4 = vcmask 408576   ;;  %vm1916_vm5 = vcmask 80896  }
   0x2   :  { %v1973_v2 = vld [vmem:[%s4347_s2 + $0x78] sm:$0xff]  ;;  %v3016_v3 = vpack.c.bf16 %v1943_v1, %v1942_v0  ;;  %v1974_v4 = vld [vmem:[%s4347_s2 + $0x80] sm:$0xff]  ;;  %v1945_v6 = vld [vmem:[%s4346_s1 + $0x90] sm:$0xff] }
   0x3   :  { %v3072_v7 = vpack.c.bf16 %v1974_v4, %v1973_v2  ;;  %v3020_v8 = vpack.c.bf16 %v1945_v6, %v1944_v5  ;;  %v1975_v9 = vld [vmem:[%s4347_s2 + $0x88] sm:$0xff]  ;;  %v1976_v10 = vld [vmem:[%s4347_s2 + $0x90] sm:$0xff]  ;;  %v1946_v11 = vld [vmem:[%s4346_s1 + $0x98] sm:$0xff] }
   0x4   :  { %3017 = vmatprep.subr.bf16.mxu0 %v3016_v3  ;;  %v3076_v12 = vpack.c.bf16 %v1976_v10, %v1975_v9  ;;  %v1947_v13 = vld [vmem:[%s4346_s1 + $0xa0] sm:$0xff]  ;;  %v1977_v14 = vld [vmem:[%s4347_s2 + $0x98] sm:$0xff]  ;;  %v1948_v18 = vld [vmem:[%s4346_s1 + $0xa8] sm:$0xff] }
   0x5   :  { %v1978_v15 = vld [vmem:[%s4347_s2 + $0xa0] sm:$0xff]  ;;  %3073 = vmatprep.subr.bf16.mxu1 %v3072_v7  ;;  %3019 = vmatpush3.bf16.msra.mxu0 %v3016_v3  ;;  %v3024_v16 = vpack.c.bf16 %v1947_v13, %v1946_v11  ;;  %v1949_v19 = vld [vmem:[%s4346_s1 + $0xb0] sm:$0xff]  ;;  %v1979_v20 = vld [vmem:[%s4347_s2 + $0xa8] sm:$0xff] }
   0x6   :  { %3075 = vmatpush3.bf16.msra.mxu1 %v3072_v7  ;;  %3021 = vmatprep.subr.bf16.mxu0 %v3020_v8  ;;  %v3080_v17 = vpack.c.bf16 %v1978_v15, %v1977_v14  ;;  %v1980_v21 = vld [vmem:[%s4347_s2 + $0xb0] sm:$0xff]  ;;  %v3028_v22 = vpack.c.bf16 %v1949_v19, %v1948_v18  ;;  %v1950_v24 = vld [vmem:[%s4346_s1 + $0xb8] sm:$0xff]  ;;  %v1951_v25 = vld [vmem:[%s4346_s1 + $0xc0] sm:$0xff] }
   0x7   :  { %3077 = vmatprep.subr.bf16.mxu1 %v3076_v12  ;;  %v3084_v23 = vpack.c.bf16 %v1980_v21, %v1979_v20  ;;  %v3541_v26 = vld [vmem:[%s4348_s0 + $0x8] sm:$0xff]  ;;  %v1981_v27 = vld [vmem:[%s4347_s2 + $0xb8] sm:$0xff]  ;;  %v1982_v28 = vld [vmem:[%s4347_s2 + $0xc0] sm:$0xff]  ;;  %v3032_v29 = vpack.c.bf16 %v1951_v25, %v1950_v24 }
   0x8   :  { %2517 = vmatprep.mubr.msk.f32.mxu0 %vm92_vm0, %v3541_v26  ;;  %2601 = vmatprep.mubr.msk.f32.mxu1 %vm92_vm0, %v3541_v26  ;;  %v3088_v30 = vpack.c.bf16 %v1982_v28, %v1981_v27  ;;  %v1952_v31 = vld [vmem:[%s4346_s1 + $0xc8] sm:$0xff]  ;;  %v1953_v32 = vld [vmem:[%s4346_s1 + $0xd0] sm:$0xff]  ;;  %v1954_v37 = vld [vmem:[%s4346_s1 + $0xd8] sm:$0xff] }
   0x9   :  { %3023 = vmatpush3.bf16.msra.mxu0 %v3020_v8  ;;  %v1983_v33 = vld [vmem:[%s4347_s2 + $0xc8] sm:$0xff]  ;;  %v1984_v34 = vld [vmem:[%s4347_s2 + $0xd0] sm:$0xff]  ;;  %v3036_v35 = vpack.c.bf16 %v1953_v32, %v1952_v31  ;;  %v1955_v38 = vld [vmem:[%s4346_s1 + $0xe0] sm:$0xff] }
   0xa   :  { %3079 = vmatpush3.bf16.msra.mxu1 %v3076_v12  ;;  %3025 = vmatprep.subr.bf16.mxu0 %v3024_v16  ;;  %v3092_v36 = vpack.c.bf16 %v1984_v34, %v1983_v33  ;;  %v1985_v39 = vld [vmem:[%s4347_s2 + $0xd8] sm:$0xff]  ;;  %v1986_v40 = vld [vmem:[%s4347_s2 + $0xe0] sm:$0xff]  ;;  %v3040_v41 = vpack.c.bf16 %v1955_v38, %v1954_v37  ;;  %v1956_v43 = vld [vmem:[%s4346_s1 + $0xe8] sm:$0xff] }
   0xb   :  { %3081 = vmatprep.subr.bf16.mxu1 %v3080_v17  ;;  %v3096_v42 = vpack.c.bf16 %v1986_v40, %v1985_v39  ;;  %v37_v44 = vld [vmem:[%s4346_s1] sm:$0xff]  ;;  %v38_v45 = vld [vmem:[%s4346_s1 + $0x8] sm:$0xff]  ;;  %v39_v50 = vld [vmem:[%s4346_s1 + $0x10] sm:$0xff] }
   0xc   :  { %v1987_v46 = vld [vmem:[%s4347_s2 + $0xe8] sm:$0xff]  ;;  %v52_v47 = vld [vmem:[%s4347_s2] sm:$0xff]  ;;  %v3044_v49 = vpack.c.bf16 %v38_v45, %v37_v44  ;;  %v40_v51 = vld [vmem:[%s4346_s1 + $0x18] sm:$0xff] }
   0xd   :  { %3027 = vmatpush3.bf16.msra.mxu0 %v3024_v16  ;;  %v53_v48 = vld [vmem:[%s4347_s2 + $0x8] sm:$0xff]  ;;  %v54_v53 = vld [vmem:[%s4347_s2 + $0x10] sm:$0xff]  ;;  %v55_v54 = vld [vmem:[%s4347_s2 + $0x18] sm:$0xff]  ;;  %v3048_v56 = vpack.c.bf16 %v40_v51, %v39_v50 }
   0xe   :  { %3083 = vmatpush3.bf16.msra.mxu1 %v3080_v17  ;;  %3029 = vmatprep.subr.bf16.mxu0 %v3028_v22  ;;  %v3100_v52 = vpack.c.bf16 %v53_v48, %v52_v47  ;;  %v3610_v55 = vld [vmem:[%s4348_s0 + $0x10] sm:$0xff]  ;;  %v3104_v57 = vpack.c.bf16 %v55_v54, %v54_v53  ;;  %v41_v58 = vld [vmem:[%s4346_s1 + $0x20] sm:$0xff]  ;;  %v42_v59 = vld [vmem:[%s4346_s1 + $0x28] sm:$0xff] }
   0xf   :  { %3085 = vmatprep.subr.bf16.mxu1 %v3084_v23  ;;  %v56_v60 = vld [vmem:[%s4347_s2 + $0x20] sm:$0xff]  ;;  %v57_v61 = vld [vmem:[%s4347_s2 + $0x28] sm:$0xff]  ;;  %v3629_v62 = vld [vmem:[%s4348_s0 + $0x18] sm:$0xff]  ;;  %v3052_v0 = vpack.c.bf16 %v42_v59, %v41_v58 }
  0x10   :  { %v3636_v63 = vld [vmem:[%s4348_s0 + $0x20] sm:$0xff]  ;;  %v3108_v1 = vpack.c.bf16 %v57_v61, %v56_v60  ;;  %v43_v2 = vld [vmem:[%s4346_s1 + $0x30] sm:$0xff]  ;;  %v44_v3 = vld [vmem:[%s4346_s1 + $0x38] sm:$0xff] }
  0x11   :  { %3031 = vmatpush3.bf16.msra.mxu0 %v3028_v22  ;;  %v58_v4 = vld [vmem:[%s4347_s2 + $0x30] sm:$0xff]  ;;  %v59_v5 = vld [vmem:[%s4347_s2 + $0x38] sm:$0xff]  ;;  %v3659_v6 = vld [vmem:[%s4348_s0 + $0x28] sm:$0xff]  ;;  %v3056_v8 = vpack.c.bf16 %v44_v3, %v43_v2 }
  0x12   :  { %3087 = vmatpush3.bf16.msra.mxu1 %v3084_v23  ;;  %3033 = vmatprep.subr.bf16.mxu0 %v3032_v29  ;;  %v3666_v7 = vld [vmem:[%s4348_s0 + $0x30] sm:$0xff]  ;;  %v3112_v9 = vpack.c.bf16 %v59_v5, %v58_v4  ;;  %v45_v10 = vld [vmem:[%s4346_s1 + $0x40] sm:$0xff]  ;;  %v46_v11 = vld [vmem:[%s4346_s1 + $0x48] sm:$0xff] }
  0x13   :  { %3089 = vmatprep.subr.bf16.mxu1 %v3088_v30  ;;  %v60_v12 = vld [vmem:[%s4347_s2 + $0x40] sm:$0xff]  ;;  %v61_v13 = vld [vmem:[%s4347_s2 + $0x48] sm:$0xff]  ;;  %v3689_v14 = vld [vmem:[%s4348_s0 + $0x38] sm:$0xff]  ;;  %v3060_v16 = vpack.c.bf16 %v46_v11, %v45_v10 }
  0x14   :  { %v3696_v15 = vld [vmem:[%s4348_s0 + $0x40] sm:$0xff]  ;;  %v3116_v17 = vpack.c.bf16 %v61_v13, %v60_v12  ;;  %v47_v18 = vld [vmem:[%s4346_s1 + $0x50] sm:$0xff]  ;;  %v48_v19 = vld [vmem:[%s4346_s1 + $0x58] sm:$0xff] }
  0x15   :  { %3035 = vmatpush3.bf16.msra.mxu0 %v3032_v29  ;;  %v62_v20 = vld [vmem:[%s4347_s2 + $0x50] sm:$0xff]  ;;  %v63_v21 = vld [vmem:[%s4347_s2 + $0x58] sm:$0xff]  ;;  %v29_v22 = vld [vmem:[%s4348_s0] sm:$0xff]  ;;  %v3064_v23 = vpack.c.bf16 %v48_v19, %v47_v18 }
  0x16   :  { %3091 = vmatpush3.bf16.msra.mxu1 %v3088_v30  ;;  %3037 = vmatprep.subr.bf16.mxu0 %v3036_v35  ;;  %v3120_v24 = vpack.c.bf16 %v63_v21, %v62_v20  ;;  %v49_v25 = vld [vmem:[%s4346_s1 + $0x60] sm:$0xff]  ;;  %v50_v27 = vld [vmem:[%s4346_s1 + $0x68] sm:$0xff]  ;;  %v51_v32 = vld [vmem:[%s4346_s1 + $0x70] sm:$0xff] }
  0x17   :  { %3093 = vmatprep.subr.bf16.mxu1 %v3092_v36  ;;  %v64_v28 = vld [vmem:[%s4347_s2 + $0x60] sm:$0xff]  ;;  %v65_v29 = vld [vmem:[%s4347_s2 + $0x68] sm:$0xff]  ;;  %v3068_v30 = vpack.c.bf16 %v50_v27, %v49_v25  ;;  %v2012_v33 = vld [vmem:[%s4346_s1 + $0xf0] sm:$0xff] }
  0x18   :  { %v3124_v31 = vpack.c.bf16 %v65_v29, %v64_v28  ;;  %v2013_v34 = vld [vmem:[%s4346_s1 + $0xf8] sm:$0xff]  ;;  %v2014_v39 = vld [vmem:[%s4346_s1 + $0x100] sm:$0xff]  ;;  %v2015_v40 = vld [vmem:[%s4346_s1 + $0x108] sm:$0xff] }
  0x19   :  { %3039 = vmatpush3.bf16.msra.mxu0 %v3036_v35  ;;  %v66_v35 = vld [vmem:[%s4347_s2 + $0x70] sm:$0xff]  ;;  %v2036_v37 = vld [vmem:[%s4347_s2 + $0xf8] sm:$0xff]  ;;  %v3128_v38 = vpack.c.bf16 %v2013_v34, %v2012_v33  ;;  %v3132_v44 = vpack.c.bf16 %v2015_v40, %v2014_v39  ;;  %v2019_v53 = vld [vmem:[%s4346_s1 + $0x128] sm:$0xff] }
  0x1a   :  { %3095 = vmatpush3.bf16.msra.mxu1 %v3092_v36  ;;  %3041 = vmatprep.subr.bf16.mxu0 %v3040_v41  ;;  %v2035_v36 = vld [vmem:[%s4347_s2 + $0xf0] sm:$0xff]  ;;  %v2017_v47 = vld [vmem:[%s4346_s1 + $0x118] sm:$0xff]  ;;  %v2042_v54 = vld [vmem:[%s4347_s2 + $0x128] sm:$0xff] }
  0x1b   :  { %3097 = vmatprep.subr.bf16.mxu1 %v3096_v42  ;;  %v2039_v48 = vld [vmem:[%s4347_s2 + $0x110] sm:$0xff]  ;;  %v2021_v59 = vld [vmem:[%s4346_s1 + $0x138] sm:$0xff]  ;;  %v2022_v2 = vld [vmem:[%s4346_s1 + $0x140] sm:$0xff] }
  0x1c   :  { %v2020_v58 = vld [vmem:[%s4346_s1 + $0x130] sm:$0xff]  ;;  %v2044_v61 = vld [vmem:[%s4347_s2 + $0x138] sm:$0xff]  ;;  %v2023_v3 = vld [vmem:[%s4346_s1 + $0x148] sm:$0xff] }
  0x1d   :  { %3043 = vmatpush3.bf16.msra.mxu0 %v3040_v41  ;;  %v3156_v41 = vpack.c.bf16 %v2036_v37, %v2035_v36  ;;  %v2043_v60 = vld [vmem:[%s4347_s2 + $0x130] sm:$0xff]  ;;  %v2045_v4 = vld [vmem:[%s4347_s2 + $0x140] sm:$0xff]  ;;  %v2046_v5 = vld [vmem:[%s4347_s2 + $0x148] sm:$0xff] }
  0x1e   :  { %3099 = vmatpush3.bf16.msra.mxu1 %v3096_v42  ;;  %2515 = vmatprep.subr.mxu0 %v1956_v43  ;;  %v2037_v42 = vld [vmem:[%s4347_s2 + $0x100] sm:$0xff]  ;;  %v2024_v10 = vld [vmem:[%s4346_s1 + $0x150] sm:$0xff]  ;;  %v2025_v11 = vld [vmem:[%s4346_s1 + $0x158] sm:$0xff] }
  0x1f   :  { %2599 = vmatprep.subr.mxu1 %v1987_v46  ;;  %v2047_v12 = vld [vmem:[%s4347_s2 + $0x150] sm:$0xff]  ;;  %v2048_v13 = vld [vmem:[%s4347_s2 + $0x158] sm:$0xff]  ;;  %v2026_v18 = vld [vmem:[%s4346_s1 + $0x160] sm:$0xff] }
  0x20   :  { %v2066_v19 = vld [vmem:[%s4346_s1 + $0x168] sm:$0xff]  ;;  %v2049_v20 = vld [vmem:[%s4347_s2 + $0x160] sm:$0xff]  ;;  %v2091_v28 = vld [vmem:[%s4347_s2 + $0x178] sm:$0xff] }
  0x21   :  { %2516 = vmatpush3.msra.mxu0 %v1956_v43  ;;  %v2038_v43 = vld [vmem:[%s4347_s2 + $0x108] sm:$0xff]  ;;  %v2069_v25 = vld [vmem:[%s4346_s1 + $0x180] sm:$0xff]  ;;  %v2071_v33 = vld [vmem:[%s4346_s1 + $0x190] sm:$0xff] }
  0x22   :  { %2600 = vmatpush3.msra.mxu1 %v1987_v46  ;;  %3045 = vmatprep.subr.bf16.mxu0 %v3044_v49  ;;  %v3160_v45 = vpack.c.bf16 %v2038_v43, %v2037_v42  ;;  %v2016_v46 = vld [vmem:[%s4346_s1 + $0x110] sm:$0xff]  ;;  %v2089_v21 = vld [vmem:[%s4347_s2 + $0x168] sm:$0xff]  ;;  %v2092_v29 = vld [vmem:[%s4347_s2 + $0x180] sm:$0xff] }
  0x23   :  { %3101 = vmatprep.subr.bf16.mxu1 %v3100_v52  ;;  %2518 = vmatmul.mubr.msk.f32.vlgmr.msra.gmra.mrb[0].mxu0 %vm92_vm0, %v3610_v55  ;;  %v3136_v50 = vpack.c.bf16 %v2017_v47, %v2016_v46  ;;  %v2093_v34 = vld [vmem:[%s4347_s2 + $0x188] sm:$0xff]  ;;  %v2073_v39 = vld [vmem:[%s4346_s1 + $0x1a0] sm:$0xff]  ;;  %v2095_v40 = vld [vmem:[%s4347_s2 + $0x198] sm:$0xff] }
  0x24   :  { %3047 = vmatpush3.bf16.msra.mxu0 %v3044_v49  ;;  %2602 = vmatmul.mubr.msk.f32.vlgmr.msra.gmra.mrb[0].mxu1 %vm92_vm0, %v3610_v55  ;;  %v2040_v49 = vld [vmem:[%s4347_s2 + $0x118] sm:$0xff]  ;;  %v2097_v46 = vld [vmem:[%s4347_s2 + $0x1a8] sm:$0xff]  ;;  %v2098_v47 = vld [vmem:[%s4347_s2 + $0x1b0] sm:$0xff] }
  0x25   :  { %3103 = vmatpush3.bf16.msra.mxu1 %v3100_v52  ;;  %3049 = vmatprep.subr.bf16.mxu0 %v3048_v56  ;;  %v3164_v51 = vpack.c.bf16 %v2040_v49, %v2039_v48  ;;  %v2018_v52 = vld [vmem:[%s4346_s1 + $0x120] sm:$0xff]  ;;  %v3946_v48 = vld [vmem:[%s4348_s0 + $0x48] sm:$0xff] }
  0x26   :  { %3105 = vmatprep.subr.bf16.mxu1 %v3104_v57  ;;  %2520 = vmatprep.mubr.msk.f32.mxu0 %vm92_vm0, %v3629_v62 }
  0x27   :  { %2604 = vmatprep.mubr.msk.f32.mxu1 %vm92_vm0, %v3629_v62  ;;  %2521 = vmatmul.mubr.msk.f32.gmra.mrb[2].mxu0 %vm92_vm0, %v3636_v63 }
  0x28   :  { %3051 = vmatpush3.bf16.msra.mxu0 %v3048_v56  ;;  %2605 = vmatmul.mubr.msk.f32.gmra.mrb[2].mxu1 %vm92_vm0, %v3636_v63  ;;  %v3140_v56 = vpack.c.bf16 %v2019_v53, %v2018_v52  ;;  %v2077_v52 = vld [vmem:[%s4346_s1 + $0x1c0] sm:$0xff]  ;;  %v2099_v53 = vld [vmem:[%s4347_s2 + $0x1b8] sm:$0xff] }
  0x29   :  { %3107 = vmatpush3.bf16.msra.mxu1 %v3104_v57  ;;  %3053 = vmatprep.subr.bf16.mxu0 %v3052_v0 }
  0x2a   :  { %3109 = vmatprep.subr.bf16.mxu1 %v3108_v1  ;;  %2523 = vmatprep.mubr.msk.f32.mxu0 %vm92_vm0, %v3659_v6 }
  0x2b   :  { %2607 = vmatprep.mubr.msk.f32.mxu1 %vm92_vm0, %v3659_v6  ;;  %2524 = vmatmul.mubr.msk.f32.gmra.mrb[4].mxu0 %vm92_vm0, %v3666_v7 }
  0x2c   :  { %3055 = vmatpush3.bf16.msra.mxu0 %v3052_v0  ;;  %2608 = vmatmul.mubr.msk.f32.gmra.mrb[4].mxu1 %vm92_vm0, %v3666_v7  ;;  %v3144_v0 = vpack.c.bf16 %v2021_v59, %v2020_v58  ;;  %v2079_v58 = vld [vmem:[%s4346_s1 + $0x1d0] sm:$0xff]  ;;  %v2101_v59 = vld [vmem:[%s4347_s2 + $0x1c8] sm:$0xff] }
  0x2d   :  { %3111 = vmatpush3.bf16.msra.mxu1 %v3108_v1  ;;  %3057 = vmatprep.subr.bf16.mxu0 %v3056_v8  ;;  %v3172_v1 = vpack.c.bf16 %v2044_v61, %v2043_v60  ;;  %v2102_v60 = vld [vmem:[%s4347_s2 + $0x1d0] sm:$0xff] }
  0x2e   :  { %3113 = vmatprep.subr.bf16.mxu1 %v3112_v9  ;;  %2526 = vmatprep.mubr.msk.f32.mxu0 %vm92_vm0, %v3689_v14 }
  0x2f   :  { %2610 = vmatprep.mubr.msk.f32.mxu1 %vm92_vm0, %v3689_v14  ;;  %2527 = vmatmul.mubr.msk.f32.gmra.mrb[6].mxu0 %vm92_vm0, %v3696_v15 }
  0x30   :  { %3059 = vmatpush3.bf16.msra.mxu0 %v3056_v8  ;;  %2611 = vmatmul.mubr.msk.f32.gmra.mrb[6].mxu1 %vm92_vm0, %v3696_v15  ;;  %v3148_v8 = vpack.c.bf16 %v2023_v3, %v2022_v2  ;;  %v2120_v2 = vld [vmem:[%s4346_s1 + $0x1e0] sm:$0xff]  ;;  %v2103_v3 = vld [vmem:[%s4347_s2 + $0x1d8] sm:$0xff] }
  0x31   :  { %3115 = vmatpush3.bf16.msra.mxu1 %v3112_v9  ;;  %3061 = vmatprep.subr.bf16.mxu0 %v3060_v16  ;;  %v3176_v9 = vpack.c.bf16 %v2046_v5, %v2045_v4  ;;  %v2143_v4 = vld [vmem:[%s4347_s2 + $0x1e0] sm:$0xff]  ;;  %v2144_v5 = vld [vmem:[%s4347_s2 + $0x1e8] sm:$0xff] }
  0x32   :  { %3117 = vmatprep.subr.bf16.mxu1 %v3116_v17  ;;  %2559 = vmatprep.mubr.msk.f32.mxu0 %vm92_vm0, %v29_v22 }
  0x33   :  { %2643 = vmatprep.mubr.msk.f32.mxu1 %vm92_vm0, %v29_v22  ;;  %v2090_v22 = vld [vmem:[%s4347_s2 + $0x170] sm:$0xff] }
  0x34   :  { %3063 = vmatpush3.bf16.msra.mxu0 %v3060_v16  ;;  %v3152_v16 = vpack.c.bf16 %v2025_v11, %v2024_v10  ;;  %v3212_v27 = vpack.c.bf16 %v2090_v22, %v2089_v21  ;;  %v2123_v10 = vld [vmem:[%s4346_s1 + $0x1f8] sm:$0xff]  ;;  %v3268_v11 = vpack.c.bf16 %v2144_v5, %v2143_v4 }
  0x35   :  { %3119 = vmatpush3.bf16.msra.mxu1 %v3116_v17  ;;  %3065 = vmatprep.subr.bf16.mxu0 %v3064_v23  ;;  %v3180_v17 = vpack.c.bf16 %v2048_v13, %v2047_v12  ;;  %v2145_v12 = vld [vmem:[%s4347_s2 + $0x1f0] sm:$0xff]  ;;  %v2146_v13 = vld [vmem:[%s4347_s2 + $0x1f8] sm:$0xff] }
  0x36   :  { %3121 = vmatprep.subr.bf16.mxu1 %v3120_v24  ;;  %v1484_v4 = vld [vmem:[%s4349_s4 + $0x38] sm:$0xff] }
  0x38   :  { %3067 = vmatpush3.bf16.msra.mxu0 %v3064_v23 }
  0x39   :  { %3123 = vmatpush3.bf16.msra.mxu1 %v3120_v24  ;;  %3069 = vmatprep.subr.bf16.mxu0 %v3068_v30  ;;  %v2068_v24 = vld [vmem:[%s4346_s1 + $0x178] sm:$0xff] }
  0x3a   :  { %3125 = vmatprep.subr.bf16.mxu1 %v3124_v31 }
  0x3c   :  { %3071 = vmatpush3.bf16.msra.mxu0 %v3068_v30  ;;  %v3188_v30 = vpack.c.bf16 %v2069_v25, %v2068_v24  ;;  %v2127_v24 = vld [vmem:[%s4346_s1 + $0x218] sm:$0xff]  ;;  %v2149_v25 = vld [vmem:[%s4347_s2 + $0x210] sm:$0xff] }
  0x3d   :  { %3127 = vmatpush3.bf16.msra.mxu1 %v3124_v31  ;;  %2557 = vmatprep.subr.mxu0 %v51_v32  ;;  %v3216_v31 = vpack.c.bf16 %v2092_v29, %v2091_v28 }
  0x3e   :  { %2641 = vmatprep.subr.mxu1 %v66_v35 }
  0x40   :  { %2558 = vmatpush3.msra.mxu0 %v51_v32  ;;  %v2070_v32 = vld [vmem:[%s4346_s1 + $0x188] sm:$0xff] }
  0x41   :  { %2642 = vmatpush3.msra.mxu1 %v66_v35  ;;  %3129 = vmatprep.subr.bf16.mxu0 %v3128_v38  ;;  %v2094_v35 = vld [vmem:[%s4347_s2 + $0x190] sm:$0xff]  ;;  %v3192_v36 = vpack.c.bf16 %v2071_v33, %v2070_v32  ;;  %v2151_v32 = vld [vmem:[%s4347_s2 + $0x220] sm:$0xff]  ;;  %v2152_v33 = vld [vmem:[%s4347_s2 + $0x228] sm:$0xff] }
  0x42   :  { %3157 = vmatprep.subr.bf16.mxu1 %v3156_v41  ;;  %2560 = vmatmul.mubr.msk.f32.vlgmr.msra.gmra.mrb[0].mxu0 %vm92_vm0, %v3541_v26  ;;  %v3220_v37 = vpack.c.bf16 %v2094_v35, %v2093_v34  ;;  %v4073_v34 = vld [vmem:[%s4348_s0 + $0x50] sm:$0xff] }
  0x43   :  { %2644 = vmatmul.mubr.msk.f32.vlgmr.msra.gmra.mrb[0].mxu1 %vm92_vm0, %v3541_v26  ;;  %3131 = vmatpush3.bf16.msra.mxu0 %v3128_v38  ;;  %v2041_v26 = vld [vmem:[%s4347_s2 + $0x120] sm:$0xff]  ;;  %v2072_v38 = vld [vmem:[%s4346_s1 + $0x198] sm:$0xff] }
  0x44   :  { %3159 = vmatpush3.bf16.msra.mxu1 %v3156_v41  ;;  %3133 = vmatprep.subr.bf16.mxu0 %v3132_v44  ;;  %v3168_v57 = vpack.c.bf16 %v2042_v54, %v2041_v26  ;;  %v2096_v41 = vld [vmem:[%s4347_s2 + $0x1a0] sm:$0xff]  ;;  %v3196_v42 = vpack.c.bf16 %v2073_v39, %v2072_v38  ;;  %v2131_v38 = vld [vmem:[%s4346_s1 + $0x238] sm:$0xff]  ;;  %v2153_v39 = vld [vmem:[%s4347_s2 + $0x230] sm:$0xff] }
  0x45   :  { %3161 = vmatprep.subr.bf16.mxu1 %v3160_v45  ;;  %2562 = vmatprep.mubr.msk.f32.mxu0 %vm92_vm0, %v3610_v55  ;;  %v3224_v43 = vpack.c.bf16 %v2096_v41, %v2095_v40  ;;  %v2100_v26 = vld [vmem:[%s4347_s2 + $0x1c0] sm:$0xff]  ;;  %v2154_v40 = vld [vmem:[%s4347_s2 + $0x238] sm:$0xff] }
  0x46   :  { %2646 = vmatprep.mubr.msk.f32.mxu1 %vm92_vm0, %v3610_v55  ;;  %2563 = vmatmul.mubr.msk.f32.gmra.mrb[2].mxu0 %vm92_vm0, %v3629_v62 }
  0x47   :  { %3135 = vmatpush3.bf16.msra.mxu0 %v3132_v44  ;;  %2647 = vmatmul.mubr.msk.f32.gmra.mrb[2].mxu1 %vm92_vm0, %v3629_v62  ;;  %v2074_v44 = vld [vmem:[%s4346_s1 + $0x1a8] sm:$0xff] }
  0x48   :  { %3163 = vmatpush3.bf16.msra.mxu1 %v3160_v45  ;;  %3137 = vmatprep.subr.bf16.mxu0 %v3136_v50  ;;  %v2075_v45 = vld [vmem:[%s4346_s1 + $0x1b0] sm:$0xff] }
  0x49   :  { %3165 = vmatprep.subr.bf16.mxu1 %v3164_v51  ;;  %2565 = vmatprep.mubr.msk.f32.mxu0 %vm92_vm0, %v3636_v63  ;;  %v3200_v49 = vpack.c.bf16 %v2075_v45, %v2074_v44  ;;  %v2133_v44 = vld [vmem:[%s4346_s1 + $0x248] sm:$0xff]  ;;  %v2155_v45 = vld [vmem:[%s4347_s2 + $0x240] sm:$0xff] }
  0x4a   :  { %2649 = vmatprep.mubr.msk.f32.mxu1 %vm92_vm0, %v3636_v63  ;;  %2566 = vmatmul.mubr.msk.f32.gmra.mrb[4].mxu0 %vm92_vm0, %v3659_v6 }
  0x4b   :  { %3139 = vmatpush3.bf16.msra.mxu0 %v3136_v50  ;;  %2650 = vmatmul.mubr.msk.f32.gmra.mrb[4].mxu1 %vm92_vm0, %v3659_v6  ;;  %v3228_v50 = vpack.c.bf16 %v2098_v47, %v2097_v46  ;;  %v2156_v46 = vld [vmem:[%s4347_s2 + $0x248] sm:$0xff] }
  0x4c   :  { %3167 = vmatpush3.bf16.msra.mxu1 %v3164_v51  ;;  %3141 = vmatprep.subr.bf16.mxu0 %v3140_v56  ;;  %v2076_v51 = vld [vmem:[%s4346_s1 + $0x1b8] sm:$0xff] }
  0x4d   :  { %3169 = vmatprep.subr.bf16.mxu1 %v3168_v57  ;;  %2568 = vmatprep.mubr.msk.f32.mxu0 %vm92_vm0, %v3666_v7  ;;  %v3204_v54 = vpack.c.bf16 %v2077_v52, %v2076_v51  ;;  %v2157_v51 = vld [vmem:[%s4347_s2 + $0x250] sm:$0xff]  ;;  %v1478_v52 = vld [vmem:[%s4349_s4 + $0x8] sm:$0xff] }
  0x4e   :  { %2652 = vmatprep.mubr.msk.f32.mxu1 %vm92_vm0, %v3666_v7  ;;  %2569 = vmatmul.mubr.msk.f32.gmra.mrb[6].mxu0 %vm92_vm0, %v3689_v14 }
  0x4f   :  { %3143 = vmatpush3.bf16.msra.mxu0 %v3140_v56  ;;  %2653 = vmatmul.mubr.msk.f32.gmra.mrb[6].mxu1 %vm92_vm0, %v3689_v14  ;;  %v3232_v56 = vpack.c.bf16 %v2100_v26, %v2099_v53  ;;  %v2167_v26 = vld [vmem:[%s4349_s4 + $0x50] sm:$0xff] }
  0x50   :  { %3171 = vmatpush3.bf16.msra.mxu1 %v3168_v57  ;;  %3145 = vmatprep.subr.bf16.mxu0 %v3144_v0  ;;  %v2078_v57 = vld [vmem:[%s4346_s1 + $0x1c8] sm:$0xff] }
  0x51   :  { %3173 = vmatprep.subr.bf16.mxu1 %v3172_v1  ;;  %2685 = vmatprep.mubr.msk.f32.mxu0 %vm92_vm0, %v3610_v55  ;;  %v3208_v61 = vpack.c.bf16 %v2079_v58, %v2078_v57  ;;  %v1480_v57 = vld [vmem:[%s4349_s4 + $0x18] sm:$0xff]  ;;  %v3436_v58 = vmov 0.0|0.0  }
  0x52   :  { %2727 = vmatprep.mubr.msk.f32.mxu1 %vm92_vm0, %v3610_v55  ;;  %v2067_v55 = vld [vmem:[%s4346_s1 + $0x170] sm:$0xff] }
  0x53   :  { %3147 = vmatpush3.bf16.msra.mxu0 %v3144_v0  ;;  %v3184_v23 = vpack.c.bf16 %v2067_v55, %v2066_v19  ;;  %v3236_v0 = vpack.c.bf16 %v2102_v60, %v2101_v59  ;;  %v2125_v19 = vld [vmem:[%s4346_s1 + $0x208] sm:$0xff]  ;;  %v2147_v55 = vld [vmem:[%s4347_s2 + $0x200] sm:$0xff] }
  0x54   :  { %3175 = vmatpush3.bf16.msra.mxu1 %v3172_v1  ;;  %3149 = vmatprep.subr.bf16.mxu0 %v3148_v8  ;;  %v2080_v1 = vld [vmem:[%s4346_s1 + $0x1d8] sm:$0xff] }
  0x55   :  { %3177 = vmatprep.subr.bf16.mxu1 %v3176_v9 }
  0x57   :  { %3151 = vmatpush3.bf16.msra.mxu0 %v3148_v8 }
  0x58   :  { %3179 = vmatpush3.bf16.msra.mxu1 %v3176_v9  ;;  %3153 = vmatprep.subr.bf16.mxu0 %v3152_v16  ;;  %v2122_v9 = vld [vmem:[%s4346_s1 + $0x1f0] sm:$0xff] }
  0x59   :  { %3181 = vmatprep.subr.bf16.mxu1 %v3180_v17 }
  0x5b   :  { %3155 = vmatpush3.bf16.msra.mxu0 %v3152_v16  ;;  %v3244_v16 = vpack.c.bf16 %v2123_v10, %v2122_v9  ;;  %v2174_v9 = vld [vmem:[%s4349_s4 + $0x88] sm:$0xff]  ;;  %v1485_v10 = vld [vmem:[%s4349_s4 + $0x40] sm:$0xff] }
  0x5c   :  { %3183 = vmatpush3.bf16.msra.mxu1 %v3180_v17  ;;  %2683 = vmatprep.subr.mxu0 %v2026_v18  ;;  %v3272_v17 = vpack.c.bf16 %v2146_v13, %v2145_v12  ;;  %v1486_v12 = vld [vmem:[%s4349_s4 + $0x48] sm:$0xff] }
  0x5d   :  { %2725 = vmatprep.subr.mxu1 %v2049_v20  ;;  %v3324_v13 = vpack.c.bf16 %v1486_v12, %v1485_v10  ;;  %v2186_v10 = vld [vmem:[%s4349_s4 + $0xd8] sm:$0xff] }
  0x5e   :  { %v2199_v12 = vld [vmem:[%s4349_s4 + $0x138] sm:$0xff] }
  0x5f   :  { %2684 = vmatpush3.msra.mxu0 %v2026_v18  ;;  %v2124_v18 = vld [vmem:[%s4346_s1 + $0x200] sm:$0xff] }
  0x60   :  { %2726 = vmatpush3.msra.mxu1 %v2049_v20  ;;  %3185 = vmatprep.subr.bf16.mxu0 %v3184_v23  ;;  %v2148_v20 = vld [vmem:[%s4347_s2 + $0x208] sm:$0xff]  ;;  %v3248_v21 = vpack.c.bf16 %v2125_v19, %v2124_v18  ;;  %v3438_v19 = vmov 0.0  }
  0x61   :  { %3213 = vmatprep.subr.bf16.mxu1 %v3212_v27  ;;  %2686 = vmatmul.mubr.msk.f32.vlgmr.msra.gmra.mrb[0].mxu0 %vm92_vm0, %v3629_v62  ;;  %v3276_v22 = vpack.c.bf16 %v2148_v20, %v2147_v55 }
  0x62   :  { %2728 = vmatmul.mubr.msk.f32.vlgmr.msra.gmra.mrb[0].mxu1 %vm92_vm0, %v3629_v62  ;;  %3187 = vmatpush3.bf16.msra.mxu0 %v3184_v23  ;;  %v2126_v23 = vld [vmem:[%s4346_s1 + $0x210] sm:$0xff] }
  0x63   :  { %3215 = vmatpush3.bf16.msra.mxu1 %v3212_v27  ;;  %3189 = vmatprep.subr.bf16.mxu0 %v3188_v30  ;;  %v2150_v27 = vld [vmem:[%s4347_s2 + $0x218] sm:$0xff]  ;;  %v3252_v28 = vpack.c.bf16 %v2127_v24, %v2126_v23 }
  0x64   :  { %3217 = vmatprep.subr.bf16.mxu1 %v3216_v31  ;;  %2688 = vmatprep.mubr.msk.f32.mxu0 %vm92_vm0, %v3636_v63  ;;  %v3280_v29 = vpack.c.bf16 %v2150_v27, %v2149_v25  ;;  %v4225_v25 = vld [vmem:[%s4350_s3] ss:$0 sm:$0xff] }
  0x65   :  { %2730 = vmatprep.mubr.msk.f32.mxu1 %vm92_vm0, %v3636_v63  ;;  %2689 = vmatmul.mubr.msk.f32.gmra.mrb[2].mxu0 %vm92_vm0, %v3659_v6 }
  0x66   :  { %3191 = vmatpush3.bf16.msra.mxu0 %v3188_v30  ;;  %2731 = vmatmul.mubr.msk.f32.gmra.mrb[2].mxu1 %vm92_vm0, %v3659_v6  ;;  %v2128_v30 = vld [vmem:[%s4346_s1 + $0x220] sm:$0xff] }
  0x67   :  { %3219 = vmatpush3.bf16.msra.mxu1 %v3216_v31  ;;  %3193 = vmatprep.subr.bf16.mxu0 %v3192_v36  ;;  %v2129_v31 = vld [vmem:[%s4346_s1 + $0x228] sm:$0xff] }
  0x68   :  { %3221 = vmatprep.subr.bf16.mxu1 %v3220_v37  ;;  %2691 = vmatprep.mubr.msk.f32.mxu0 %vm92_vm0, %v3666_v7  ;;  %v3256_v35 = vpack.c.bf16 %v2129_v31, %v2128_v30  ;;  %v2190_v31 = vld [vmem:[%s4349_s4 + $0xf0] sm:$0xff] }
  0x69   :  { %2733 = vmatprep.mubr.msk.f32.mxu1 %vm92_vm0, %v3666_v7  ;;  %2692 = vmatmul.mubr.msk.f32.gmra.mrb[4].mxu0 %vm92_vm0, %v3689_v14 }
  0x6a   :  { %3195 = vmatpush3.bf16.msra.mxu0 %v3192_v36  ;;  %2734 = vmatmul.mubr.msk.f32.gmra.mrb[4].mxu1 %vm92_vm0, %v3689_v14  ;;  %v3284_v36 = vpack.c.bf16 %v2152_v33, %v2151_v32  ;;  %v2191_v32 = vld [vmem:[%s4349_s4 + $0xf8] sm:$0xff] }
  0x6b   :  { %3223 = vmatpush3.bf16.msra.mxu1 %v3220_v37  ;;  %3197 = vmatprep.subr.bf16.mxu0 %v3196_v42  ;;  %v2130_v37 = vld [vmem:[%s4346_s1 + $0x230] sm:$0xff] }
  0x6c   :  { %3225 = vmatprep.subr.bf16.mxu1 %v3224_v43  ;;  %2694 = vmatprep.mubr.msk.f32.mxu0 %vm92_vm0, %v3696_v15  ;;  %v3260_v41 = vpack.c.bf16 %v2131_v38, %v2130_v37  ;;  %v3342_v38 = vpack.c.bf16 %v2191_v32, %v2190_v31  ;;  %v1828_v31 = vld [vmem:[%s4351_s6 + $0x20] sm:$0xff]  ;;  %v1829_v32 = vld [vmem:[%s4351_s6 + $0x28] sm:$0xff] }
  0x6d   :  { %2736 = vmatprep.mubr.msk.f32.mxu1 %vm92_vm0, %v3696_v15  ;;  %2695 = vmatmul.mubr.msk.f32.gmra.mrb[6].mxu0 %vm92_vm0, %v3946_v48 }
  0x6e   :  { %3199 = vmatpush3.bf16.msra.mxu0 %v3196_v42  ;;  %2737 = vmatmul.mubr.msk.f32.gmra.mrb[6].mxu1 %vm92_vm0, %v3946_v48  ;;  %v3288_v42 = vpack.c.bf16 %v2154_v40, %v2153_v39  ;;  %v2179_v39 = vld [vmem:[%s4349_s4 + $0xa0] sm:$0xff] }
  0x6f   :  { %3227 = vmatpush3.bf16.msra.mxu1 %v3224_v43  ;;  %3201 = vmatprep.subr.bf16.mxu0 %v3200_v49  ;;  %v2132_v43 = vld [vmem:[%s4346_s1 + $0x240] sm:$0xff] }
  0x70   :  { %3229 = vmatprep.subr.bf16.mxu1 %v3228_v50  ;;  %2769 = vmatprep.mubr.msk.f32.mxu0 %vm92_vm0, %v3629_v62  ;;  %v3264_v47 = vpack.c.bf16 %v2133_v44, %v2132_v43  ;;  %v2180_v44 = vld [vmem:[%s4349_s4 + $0xa8] sm:$0xff] }
  0x71   :  { %2811 = vmatprep.mubr.msk.f32.mxu1 %vm92_vm0, %v3629_v62  ;;  %v2121_v62 = vld [vmem:[%s4346_s1 + $0x1e8] sm:$0xff] }
  0x72   :  { %3203 = vmatpush3.bf16.msra.mxu0 %v3200_v49  ;;  %v3240_v8 = vpack.c.bf16 %v2121_v62, %v2120_v2  ;;  %v3292_v49 = vpack.c.bf16 %v2156_v46, %v2155_v45  ;;  %v1483_v62 = vld [vmem:[%s4349_s4 + $0x30] sm:$0xff]  ;;  %v2192_v45 = vld [vmem:[%s4349_s4 + $0x100] sm:$0xff]  ;;  %v2193_v46 = vld [vmem:[%s4349_s4 + $0x108] sm:$0xff] }
  0x73   :  { %3231 = vmatpush3.bf16.msra.mxu1 %v3228_v50  ;;  %3205 = vmatprep.subr.bf16.mxu0 %v3204_v54  ;;  %v2134_v50 = vld [vmem:[%s4346_s1 + $0x250] sm:$0xff]  ;;  %v3321_v5 = vpack.c.bf16 %v1484_v4, %v1483_v62  ;;  %v2184_v62 = vld [vmem:[%s4349_s4 + $0xc8] sm:$0xff] }
  0x74   :  { %3233 = vmatprep.subr.bf16.mxu1 %v3232_v56  ;;  %v2197_v4 = vld [vmem:[%s4349_s4 + $0x128] sm:$0xff] }
  0x76   :  { %3207 = vmatpush3.bf16.msra.mxu0 %v3204_v54  ;;  %v2168_v54 = vld [vmem:[%s4349_s4 + $0x58] sm:$0xff] }
  0x77   :  { %3235 = vmatpush3.bf16.msra.mxu1 %v3232_v56  ;;  %3209 = vmatprep.subr.bf16.mxu0 %v3208_v61  ;;  %v1479_v56 = vld [vmem:[%s4349_s4 + $0x10] sm:$0xff]  ;;  %v3297_v59 = vpack.c.bf16 %v2168_v54, %v2167_v26 }
  0x78   :  { %3237 = vmatprep.subr.bf16.mxu1 %v3236_v0  ;;  %v3315_v60 = vpack.c.bf16 %v1480_v57, %v1479_v56  ;;  %v2181_v26 = vld [vmem:[%s4349_s4 + $0xb0] sm:$0xff] }
  0x7a   :  { %3211 = vmatpush3.bf16.msra.mxu0 %v3208_v61  ;;  %v2169_v61 = vld [vmem:[%s4349_s4 + $0x60] sm:$0xff] }
  0x7b   :  { %3239 = vmatpush3.bf16.msra.mxu1 %v3236_v0  ;;  %2767 = vmatprep.subr.mxu0 %v2080_v1  ;;  %v1482_v0 = vld [vmem:[%s4349_s4 + $0x28] sm:$0xff] }
  0x7c   :  { %2809 = vmatprep.subr.mxu1 %v2103_v3 }
  0x7e   :  { %2768 = vmatpush3.msra.mxu0 %v2080_v1 }
  0x7f   :  { %2810 = vmatpush3.msra.mxu1 %v2103_v3  ;;  %3241 = vmatprep.subr.bf16.mxu0 %v3240_v8 }
  0x80   :  { %3269 = vmatprep.subr.bf16.mxu1 %v3268_v11  ;;  %2770 = vmatmul.mubr.msk.f32.vlgmr.msra.gmra.mrb[0].mxu0 %vm92_vm0, %v3636_v63 }
  0x81   :  { %2812 = vmatmul.mubr.msk.f32.vlgmr.msra.gmra.mrb[0].mxu1 %vm92_vm0, %v3636_v63  ;;  %3243 = vmatpush3.bf16.msra.mxu0 %v3240_v8  ;;  %v2173_v8 = vld [vmem:[%s4349_s4 + $0x80] sm:$0xff] }
  0x82   :  { %3271 = vmatpush3.bf16.msra.mxu1 %v3268_v11  ;;  %3245 = vmatprep.subr.bf16.mxu0 %v3244_v16  ;;  %v3306_v11 = vpack.c.bf16 %v2174_v9, %v2173_v8  ;;  %v2185_v9 = vld [vmem:[%s4349_s4 + $0xd0] sm:$0xff] }
  0x83   :  { %3273 = vmatprep.subr.bf16.mxu1 %v3272_v17  ;;  %2772 = vmatprep.mubr.msk.f32.mxu0 %vm92_vm0, %v3659_v6 }
  0x84   :  { %2814 = vmatprep.mubr.msk.f32.mxu1 %vm92_vm0, %v3659_v6  ;;  %2773 = vmatmul.mubr.msk.f32.gmra.mrb[2].mxu0 %vm92_vm0, %v3666_v7 }
  0x85   :  { %3247 = vmatpush3.bf16.msra.mxu0 %v3244_v16  ;;  %2815 = vmatmul.mubr.msk.f32.gmra.mrb[2].mxu1 %vm92_vm0, %v3666_v7  ;;  %v2175_v16 = vld [vmem:[%s4349_s4 + $0x90] sm:$0xff] }
  0x86   :  { %3275 = vmatpush3.bf16.msra.mxu1 %v3272_v17  ;;  %3249 = vmatprep.subr.bf16.mxu0 %v3248_v21  ;;  %v2176_v17 = vld [vmem:[%s4349_s4 + $0x98] sm:$0xff] }
  0x87   :  { %3277 = vmatprep.subr.bf16.mxu1 %v3276_v22  ;;  %2775 = vmatprep.mubr.msk.f32.mxu0 %vm92_vm0, %v3689_v14  ;;  %v3309_v18 = vpack.c.bf16 %v2176_v17, %v2175_v16 }
  0x88   :  { %2817 = vmatprep.mubr.msk.f32.mxu1 %vm92_vm0, %v3689_v14  ;;  %2776 = vmatmul.mubr.msk.f32.gmra.mrb[4].mxu0 %vm92_vm0, %v3696_v15 }
  0x89   :  { %3251 = vmatpush3.bf16.msra.mxu0 %v3248_v21  ;;  %2818 = vmatmul.mubr.msk.f32.gmra.mrb[4].mxu1 %vm92_vm0, %v3696_v15 }
  0x8a   :  { %3279 = vmatpush3.bf16.msra.mxu1 %v3276_v22  ;;  %3253 = vmatprep.subr.bf16.mxu0 %v3252_v28 }
  0x8b   :  { %3281 = vmatprep.subr.bf16.mxu1 %v3280_v29  ;;  %2778 = vmatprep.mubr.msk.f32.mxu0 %vm92_vm0, %v3946_v48 }
  0x8c   :  { %2820 = vmatprep.mubr.msk.f32.mxu1 %vm92_vm0, %v3946_v48  ;;  %2779 = vmatmul.mubr.msk.f32.gmra.mrb[6].mxu0 %vm92_vm0, %v4073_v34 }
  0x8d   :  { %3255 = vmatpush3.bf16.msra.mxu0 %v3252_v28  ;;  %2821 = vmatmul.mubr.msk.f32.gmra.mrb[6].mxu1 %vm92_vm0, %v4073_v34 }
  0x8e   :  { %3283 = vmatpush3.bf16.msra.mxu1 %v3280_v29  ;;  %3257 = vmatprep.subr.bf16.mxu0 %v3256_v35 }
  0x8f   :  { %3285 = vmatprep.subr.bf16.mxu1 %v3284_v36  ;;  %2853 = vmatprep.mubr.msk.f32.mxu0 %vm92_vm0, %v3636_v63 }
  0x90   :  { %2895 = vmatprep.mubr.msk.f32.mxu1 %vm92_vm0, %v3636_v63  ;;  %v1477_v63 = vld [vmem:[%s4349_s4] sm:$0xff] }
  0x91   :  { %3259 = vmatpush3.bf16.msra.mxu0 %v3256_v35  ;;  %v3312_v53 = vpack.c.bf16 %v1478_v52, %v1477_v63  ;;  %v3327_v52 = vpack.c.bf16 %v2180_v44, %v2179_v39 }
  0x92   :  { %3287 = vmatpush3.bf16.msra.mxu1 %v3284_v36  ;;  %3261 = vmatprep.subr.bf16.mxu0 %v3260_v41 }
  0x93   :  { %3289 = vmatprep.subr.bf16.mxu1 %v3288_v42 }
  0x95   :  { %3263 = vmatpush3.bf16.msra.mxu0 %v3260_v41 }
  0x96   :  { %3291 = vmatpush3.bf16.msra.mxu1 %v3288_v42  ;;  %3265 = vmatprep.subr.bf16.mxu0 %v3264_v47 }
  0x97   :  { %3293 = vmatprep.subr.bf16.mxu1 %v3292_v49 }
  0x99   :  { %3267 = vmatpush3.bf16.msra.mxu0 %v3264_v47 }
  0x9a   :  { %3295 = vmatpush3.bf16.msra.mxu1 %v3292_v49  ;;  %2851 = vmatprep.subr.mxu0 %v2134_v50 }
  0x9b   :  { %2893 = vmatprep.subr.mxu1 %v2157_v51 }
  0x9d   :  { %2852 = vmatpush3.msra.mxu0 %v2134_v50 }
  0x9e   :  { %2894 = vmatpush3.msra.mxu1 %v2157_v51  ;;  %2854 = vmatmul.mubr.msk.f32.vlgmr.msra.gmra.mrb[0].mxu0 %vm92_vm0, %v3659_v6 }
  0x9f   :  { %2896 = vmatmul.mubr.msk.f32.vlgmr.msra.gmra.mrb[0].mxu1 %vm92_vm0, %v3659_v6  ;;  %2856 = vmatprep.mubr.msk.f32.mxu0 %vm92_vm0, %v3666_v7  ;;  %v2170_v6 = vld [vmem:[%s4349_s4 + $0x68] sm:$0xff] }
  0xa0   :  { %2898 = vmatprep.mubr.msk.f32.mxu1 %vm92_vm0, %v3666_v7  ;;  %3311 = vmatprep.subr.bf16.mxu1 %v3436_v58  ;;  %v1481_v7 = vld [vmem:[%s4349_s4 + $0x20] sm:$0xff]  ;;  %v3300_v1 = vpack.c.bf16 %v2170_v6, %v2169_v61  ;;  %v2194_v61 = vld [vmem:[%s4349_s4 + $0x110] sm:$0xff]  ;;  %v2195_v6 = vld [vmem:[%s4349_s4 + $0x118] sm:$0xff] }
  0xa1   :  { %3313 = vmatpush3.bf16.msra.mxu1 %v3312_v53  ;;  %3296 = vmatprep.subr.bf16.mxu0 %v3436_v58  ;;  %v3318_v2 = vpack.c.bf16 %v1482_v0, %v1481_v7  ;;  %v3345_v53 = vpack.c.bf16 %v2193_v46, %v2192_v45 }
  0xa2   :  { %2857 = vmatmul.mubr.msk.f32.gmra.mrb[2].mxu0 %vm92_vm0, %v3689_v14  ;;  %3314 = vmatprep.subr.bf16.mxu1 %v3436_v58 }
  0xa3   :  { %2899 = vmatmul.mubr.msk.f32.gmra.mrb[2].mxu1 %vm92_vm0, %v3689_v14  ;;  %2859 = vmatprep.mubr.msk.f32.mxu0 %vm92_vm0, %v3696_v15  ;;  %v2119_v14 = vld [vmem:[%s4348_s0 + $0x58] sm:$0xff] }
  0xa4   :  { %2901 = vmatprep.mubr.msk.f32.mxu1 %vm92_vm0, %v3696_v15  ;;  %3298 = vmatpush3.bf16.msra.mxu0 %v3297_v59  ;;  %v2171_v15 = vld [vmem:[%s4349_s4 + $0x70] sm:$0xff] }
  0xa5   :  { %3316 = vmatpush3.bf16.msra.mxu1 %v3315_v60  ;;  %3299 = vmatprep.subr.bf16.mxu0 %v3436_v58  ;;  %v2182_v60 = vld [vmem:[%s4349_s4 + $0xb8] sm:$0xff] }
  0xa6   :  { %2860 = vmatmul.mubr.msk.f32.gmra.mrb[4].mxu0 %vm92_vm0, %v3946_v48  ;;  %3317 = vmatprep.subr.bf16.mxu1 %v3436_v58 }
  0xa7   :  { %2902 = vmatmul.mubr.msk.f32.gmra.mrb[4].mxu1 %vm92_vm0, %v3946_v48  ;;  %2862 = vmatprep.mubr.msk.f32.mxu0 %vm92_vm0, %v4073_v34  ;;  %v2172_v48 = vld [vmem:[%s4349_s4 + $0x78] sm:$0xff] }
  0xa8   :  { %2904 = vmatprep.mubr.msk.f32.mxu1 %vm92_vm0, %v4073_v34  ;;  %3301 = vmatpush3.bf16.msra.mxu0 %v3300_v1  ;;  %v3303_v3 = vpack.c.bf16 %v2172_v48, %v2171_v15  ;;  %v2183_v15 = vld [vmem:[%s4349_s4 + $0xc0] sm:$0xff] }
  0xa9   :  { %3319 = vmatpush3.bf16.msra.mxu1 %v3318_v2  ;;  %3302 = vmatprep.subr.bf16.mxu0 %v3436_v58  ;;  %v3330_v2 = vpack.c.bf16 %v2182_v60, %v2181_v26 }
  0xaa   :  { %2863 = vmatmul.mubr.msk.f32.gmra.mrb[6].mxu0 %vm92_vm0, %v2119_v14  ;;  %3320 = vmatprep.subr.bf16.mxu1 %v3436_v58 }
  0xab   :  { %2905 = vmatmul.mubr.msk.f32.gmra.mrb[6].mxu1 %vm92_vm0, %v2119_v14  ;;  %2927 = vmatprep.mubr.msk.f32.mxu0 %vm3437_vm1, %v3438_v19  ;;  %v3348_v14 = vpack.c.bf16 %v2195_v6, %v2194_v61 }
  0xac   :  { %3304 = vmatpush3.bf16.msra.mxu0 %v3303_v3  ;;  %2950 = vmatprep.mubr.msk.f32.mxu1 %vm3437_vm1, %v3438_v19  ;;  %v2196_v3 = vld [vmem:[%s4349_s4 + $0x120] sm:$0xff] }
  0xad   :  { %3322 = vmatpush3.bf16.msra.mxu1 %v3321_v5  ;;  %3305 = vmatprep.subr.bf16.mxu0 %v3436_v58  ;;  %v3333_v5 = vpack.c.bf16 %v2184_v62, %v2183_v15  ;;  %v3351_v8 = vpack.c.bf16 %v2197_v4, %v2196_v3 }
  0xae   :  { %3323 = vmatprep.subr.bf16.mxu1 %v3436_v58 }
  0xb0   :  { %3307 = vmatpush3.bf16.msra.mxu0 %v3306_v11  ;;  %v2198_v11 = vld [vmem:[%s4349_s4 + $0x130] sm:$0xff] }
  0xb1   :  { %3325 = vmatpush3.bf16.msra.mxu1 %v3324_v13  ;;  %3308 = vmatprep.subr.bf16.mxu0 %v3436_v58  ;;  %v3336_v13 = vpack.c.bf16 %v2186_v10, %v2185_v9  ;;  %v3354_v16 = vpack.c.bf16 %v2199_v12, %v2198_v11 }
  0xb2   :  { %3341 = vmatprep.subr.bf16.mxu1 %v3436_v58 }
  0xb4   :  { %3310 = vmatpush3.bf16.msra.mxu0 %v3309_v18  ;;  %v2187_v18 = vld [vmem:[%s4349_s4 + $0xe0] sm:$0xff] }
  0xb5   :  { %3326 = vmatprep.subr.bf16.mxu0 %v3436_v58 }
 0x171   :  { %v2855_v55 = vpop.f32.mrb[0].mxu0 }
 0x172   :  { %v2897_v20 = vpop.f32.mrb[0].mxu1  ;;  %v1274_v21 = vpop.f32.mrb[1].mxu0 }
 0x173   :  { %v1451_v22 = vmax.f32 %v2855_v55, %v2897_v20  ;;  %v1403_v23 = vpop.f32.mrb[1].mxu1  ;;  %v2188_v55 = vld [vmem:[%s4349_s4 + $0xe8] sm:$0xff] }
 0x174   :  { %v1450_v24 = vmax.f32 %v1274_v21, %v1403_v23  ;;  %v3339_v20 = vpack.c.bf16 %v2188_v55, %v2187_v18 }
 0x175   :  { %v2858_v27 = vpop.f32.mrb[2].mxu0 }
 0x176   :  { %v1458_v28 = vmax.f32 %v1450_v24, %v1451_v22  ;;  %v2900_v29 = vpop.f32.mrb[2].mxu1  ;;  %v1284_v30 = vpop.f32.mrb[3].mxu0  ;;  %v1824_v24 = vld [vmem:[%s4351_s6] sm:$0xff] }
 0x177   :  { %v1453_v33 = vmax.f32 %v2858_v27, %v2900_v29  ;;  %v1413_v34 = vpop.f32.mrb[3].mxu1  ;;  %v1827_v29 = vld [vmem:[%s4351_s6 + $0x18] sm:$0xff] }
 0x178   :  { %v1469_v35 = vadd.f32 %v4225_v25, %v1458_v28  ;;  %v1452_v36 = vmax.f32 %v1284_v30, %v1413_v34  ;;  %v1826_v28 = vld [vmem:[%s4351_s6 + $0x10] sm:$0xff] }
 0x179   :  { %v2861_v37 = vpop.f32.mrb[4].mxu0  ;;  %v3360_v30 = vpack.c.bf16 %v1827_v29, %v1826_v28  ;;  %v1830_v34 = vld [vmem:[%s4351_s6 + $0x30] sm:$0x3] }
 0x17a   :  { %v1473_v40 = vmax.f32 %v1469_v35, 0.0  ;;  %v1459_v41 = vmax.f32 %v1452_v36, %v1453_v33  ;;  %v2903_v42 = vpop.f32.mrb[4].mxu1  ;;  %v1294_v43 = vpop.f32.mrb[5].mxu0  ;;  %v3363_v33 = vpack.c.bf16 %v1829_v32, %v1828_v31 }
 0x17b   :  { %v1455_v47 = vmax.f32 %v2861_v37, %v2903_v42  ;;  %v1423_v49 = vpop.f32.mrb[5].mxu1 }
 0x17c   :  { %v1470_v50 = vadd.f32 %v4225_v25, %v1459_v41  ;;  %v1454_v51 = vmax.f32 %v1294_v43, %v1423_v49  ;;  %2951 = vmatmul.mubr.msk.f32.vlgmr.msra.gmra.mrb[8].mxu1 %vm1498_vm2, %v1473_v40 }
 0x17d   :  { %3343 = vmatpush3.bf16.msra.mxu1 %v3342_v38  ;;  %v2864_v63 = vpop.f32.mrb[6].mxu0  ;;  %2996 = vmatprep.mubr.msk.f32.mxu1 %vm3437_vm1, %v3438_v19 }
 0x17e   :  { %v1474_v54 = vmax.f32 %v1470_v50, 0.0  ;;  %v1460_v56 = vmax.f32 %v1454_v51, %v1455_v47  ;;  %v2906_v57 = vpop.f32.mrb[6].mxu1  ;;  %v1304_v59 = vpop.f32.mrb[7].mxu0  ;;  %3344 = vmatprep.subr.bf16.mxu1 %v3436_v58  ;;  %v2202_v47 = vld [vmem:[%s4353_s7] ss:$0 sm:$0xff] }
 0x17f   :  { %v1457_v7 = vmax.f32 %v2864_v63, %v2906_v57  ;;  %v1433_v0 = vpop.f32.mrb[7].mxu1 }
 0x180   :  { %v1456_v1 = vmax.f32 %v1304_v59, %v1433_v0  ;;  %2928 = vmatmul.mubr.msk.f32.vlgmr.msra.gmra.mrb[8].mxu0 %vm1498_vm2, %v1474_v54  ;;  %v1471_v21 = vadd.f32 %v4225_v25, %v1460_v56 }
 0x181   :  { %3328 = vmatpush3.bf16.msra.mxu0 %v3327_v52  ;;  %3346 = vmatpush3.bf16.msra.mxu1 %v3345_v53 }
 0x182   :  { %v1461_v48 = vmax.f32 %v1456_v1, %v1457_v7  ;;  %3329 = vmatprep.subr.bf16.mxu0 %v3436_v58  ;;  %3347 = vmatprep.subr.bf16.mxu1 %v3436_v58  ;;  %v1475_v23 = vmax.f32 %v1471_v21, 0.0 }
 0x183   :  { %2973 = vmatprep.mubr.msk.f32.mxu0 %vm3437_vm1, %v3438_v19 }
 0x184   :  { %v1472_v17 = vadd.f32 %v4225_v25, %v1461_v48  ;;  %v1825_v25 = vld [vmem:[%s4351_s6 + $0x8] sm:$0xff] }
 0x185   :  { %3331 = vmatpush3.bf16.msra.mxu0 %v3330_v2  ;;  %3349 = vmatpush3.bf16.msra.mxu1 %v3348_v14  ;;  %v3357_v27 = vpack.c.bf16 %v1825_v25, %v1824_v24 }
 0x186   :  { %3332 = vmatprep.subr.bf16.mxu0 %v3436_v58  ;;  %3350 = vmatprep.subr.bf16.mxu1 %v3436_v58  ;;  %v1476_v22 = vmax.f32 %v1472_v17, 0.0 }
 0x189   :  { %3334 = vmatpush3.bf16.msra.mxu0 %v3333_v5  ;;  %3352 = vmatpush3.bf16.msra.mxu1 %v3351_v8 }
 0x18a   :  { %3335 = vmatprep.subr.bf16.mxu0 %v3436_v58  ;;  %3353 = vmatprep.subr.bf16.mxu1 %v3436_v58 }
 0x18d   :  { %3337 = vmatpush3.bf16.msra.mxu0 %v3336_v13  ;;  %3355 = vmatpush3.bf16.msra.mxu1 %v3354_v16 }
 0x18e   :  { %3338 = vmatprep.subr.bf16.mxu0 %v3436_v58 }
 0x190   :  { %2997 = vmatmul.mubr.msk.f32.vlgmr.msra.gmra.mrb[10].mxu1 %vm1498_vm2, %v1476_v22 }
 0x191   :  { %3340 = vmatpush3.bf16.msra.mxu0 %v3339_v20 }
 0x192   :  { %3356 = vmatprep.subr.bf16.mxu0 %v3436_v58 }
 0x194   :  { %2974 = vmatmul.mubr.msk.f32.vlgmr.msra.gmra.mrb[10].mxu0 %vm1498_vm2, %v1475_v23 }
 0x195   :  { %3013 = vmatprep.mubr.msk.f32.mxu0 %vm3437_vm1, %v3438_v19  ;;  %3358 = vmatpush3.bf16.msra.mxu0 %v3357_v27 }
 0x196   :  { %3359 = vmatprep.subr.bf16.mxu0 %v3436_v58 }
 0x199   :  { %3361 = vmatpush3.bf16.msra.mxu0 %v3360_v30 }
 0x19a   :  { %3362 = vmatprep.subr.bf16.mxu0 %v3436_v58 }
 0x19d   :  { %3364 = vmatpush3.bf16.msra.mxu0 %v3363_v33 }
 0x19e   :  { %3011 = vmatprep.subr.mxu0 %v3438_v19  ;;  %v2201_v19 = vld [vmem:[%s4352_s5] ss:$0 sm:$0xff] }
 0x1a1   :  { %3012 = vmatpush3.msk.msra.mxu0 %vm1842_vm3, %v1830_v34 }
 0x24f   :  { %v1641_v35 = vpop.f32.mrb[8].mxu1 }
 0x250   :  { %v2952_v58 = vpop.f32.mrb[9].mxu1 }
 0x253   :  { %v1568_v36 = vpop.f32.mrb[8].mxu0 }
 0x254   :  { %v1642_v37 = vadd.f32 %v1641_v35, %v1568_v36  ;;  %v2929_v38 = vpop.f32.mrb[9].mxu0 }
 0x263   :  { %v1810_v39 = vpop.f32.mrb[10].mxu1 }
 0x264   :  { %v2998_v40 = vpop.f32.mrb[11].mxu1 }
 0x267   :  { %v1725_v41 = vpop.f32.mrb[10].mxu0 }
 0x268   :  { %v1729_v42 = vadd.f32 %v1725_v41, %v1642_v37  ;;  %v2975_v43 = vpop.f32.mrb[11].mxu0 }
 0x26a   :  { %v1814_v44 = vadd.f32 %v1810_v39, %v1729_v42 }
 0x26c   :  { %v1822_v45 = vadd.f32 %v2201_v19, %v1814_v44 }
 0x26e   :  { %v1823_v46 = vmax.f32 %v1822_v45, 0.0 }
 0x270   :  { %3014 = vmatmul.mubr.msk.f32.vlgmr.msra.gmra.mrb[12].mxu0 %vm1838_vm4, %v1823_v46 }
 0x343   :  { %v1912_v49 = vpop.f32.mrb[12].mxu0 }
 0x344   :  { %v1913_v50 = vadd.f32 %v2202_v47, %v1912_v49  ;;  %v3015_v51 = vpop.f32.mrb[13].mxu0 }
 0x346   :  { %v1917_v63 = vsel %vm1916_vm5, %v1913_v50, -inf }
 0x347   :  { %1918 = vmax.xlane.f32.xlu0 %v1917_v63 }
 0x3d4   :  { %v1919_v52 = vpop.xlane.xlu0 %1918 }
 0x3d5   :  { %v1920_v53 = vsub.f32 %v1913_v50, %v1919_v52 }
 0x3d7   :  { %v1921_v26 = vmul.f32 1.442695, %v1920_v53 }
 0x3d9   :  { %3432 = vpow2.f32 %v1921_v26 }
 0x3e3   :  { %v3433_v54 = vpop.eup %3432 }
 0x3e4   :  { %v1923_v56 = vsel %vm1916_vm5, %v3433_v54, 0.0 }
 0x3e5   :  { %1924 = vadd.xlane.f32.xlu0 %v1923_v56 }
 0x472   :  { %v1925_v57 = vpop.xlane.xlu0 %1924 }
 0x473   :  { %3434 = vlog2.f32 %v1925_v57 }
 0x47d   :  { %v3435_v59 = vpop.eup %3434 }
 0x47e   :  { %v1927_v60 = vmul.f32 0.6931472, %v3435_v59 }
 0x480   :  { %v1928_v61 = vsub.f32 %v1920_v53, %v1927_v60 }
 0x482   :  { %1929 = vst.msk [vmem:[%s4354_s8] sm:$0xff] %vm1916_vm5, %v1928_v61 }

</bundles_post_ra>
